<compile_context>
chip_gen: v5e
topology: v5e:2x2
jax: 0.10.0
libtpu: 0.0.40
codegen_flags: <defaults>
</compile_context>

<pallas_src>
import jax
import jax.numpy as jnp
from jax.experimental import pallas as pl
from jax.experimental.pallas import tpu as pltpu

EPS = 1e-5


def _round_up(x, m):
    return (x + m - 1) // m * m


def residual_block(x_nchw, w1, g1, b1, w2, g2, b2):
    """x_nchw: (N, C, H, W) float32 (PyTorch layout); w*: (3, 3, Cin, Cout) HWIO.
    Returns (N, C, H, W) float32."""
    N, C, H, W = x_nchw.shape
    Hp, Wp = H + 2, W + 2
    Sp = N * Hp * Wp                      # flat padded spatial length
    base = Wp + 1                         # first padded-grid position of a valid output
    L = Sp - 2 * base                     # lane extent covering every valid output
    Lp = _round_up(L, 128)                # lane-dense (unmasked store) output extent
    Sp_pad = _round_up(max(Sp, Lp + 2 * base), 128)   # padded-input lane extent
    Cpad = _round_up(C, 8)                # sublane-aligned per-tap row block
    NHW = N * H * W
    inv_nhw = 1.0 / float(NHW)

    # ---- wrapper-side layout plumbing (outside the kernel) ----
    xt = jnp.transpose(x_nchw, (1, 0, 2, 3)).astype(jnp.float32)          # (C,N,H,W)
    xpad = jnp.pad(xt, ((0, 0), (0, 0), (1, 1), (1, 1)))                  # (C,N,Hp,Wp)
    xpad_flat = jnp.pad(xpad.reshape(C, Sp), ((0, 0), (0, Sp_pad - Sp)))  # (C, Sp_pad)

    # conv weights -> (Cout, 9*Cpad) bf16; K index = (dy*3+dx)*Cpad + ci.  Channel dim
    # zero-padded to Cpad so the patch's pad rows contribute exactly zero to the dot.
    def prep_w(w):
        wt = jnp.transpose(w, (3, 0, 1, 2))                               # (Cout,3,3,Cin)
        wt = jnp.pad(wt, ((0, 0), (0, 0), (0, 0), (0, Cpad - C)))
        return wt.reshape(C, 9 * Cpad).astype(jnp.bfloat16)

    w1m = prep_w(w1)
    w2m = prep_w(w2)

    # validity mask over the output lane range [0, Lp): 1 on the N*H*W real output
    # positions, 0 on interior padding columns/rows and on the Lp-L tail lanes.
    m = jnp.zeros((N, Hp, Wp), jnp.float32).at[:, 1:H + 1, 1:W + 1].set(1.0)
    mask_l = jnp.pad(m.reshape(1, Sp)[:, base:base + L], ((0, 0), (0, Lp - L)))

    g1c = g1.reshape(C, 1).astype(jnp.float32)
    b1c = b1.reshape(C, 1).astype(jnp.float32)
    g2c = g2.reshape(C, 1).astype(jnp.float32)
    b2c = b2.reshape(C, 1).astype(jnp.float32)

    def kernel(xp_ref, mk_ref, w1_ref, g1_ref, b1_ref, w2_ref, g2_ref, b2_ref,
               o_ref, h1p_ref, patch_ref):
        mask = mk_ref[...]                                                # (1, Lp)

        # One-time zero fills: im2col pad rows (uninitialized VMEM must never feed the
        # MXU) and the small frame of the padded-h1 grid outside the window written below.
        patch_ref[...] = jnp.zeros_like(patch_ref)
        h1p_ref[:, 0:base] = jnp.zeros((C, base), jnp.float32)
        h1p_ref[:, base + Lp:Sp_pad] = jnp.zeros((C, Sp_pad - base - Lp), jnp.float32)

        def conv3x3(feat_ref, w_ref):
            # 3 lane-window loads (one per dy); dx taps are static value slices of the
            # slab.  One MXU dot with K = 9*Cpad; bf16 operands, f32 accumulation.
            for dy in range(3):
                slab = feat_ref[:, dy * Wp: dy * Wp + Lp + 2].astype(jnp.bfloat16)
                for dx in range(3):
                    t = dy * 3 + dx
                    patch_ref[t * Cpad:t * Cpad + C, :] = slab[:, dx:dx + Lp]
            return jnp.dot(w_ref[...], patch_ref[...],
                           preferred_element_type=jnp.float32)            # (C, Lp) f32

        def bn_relu(y, gamma, beta):
            # single-pass batch stats over valid lanes, kept in f32 (biased variance,
            # eps=1e-5, PyTorch training-mode forward); affine folded into one FMA.
            ym = y * mask
            ssum = jnp.sum(ym, axis=1, keepdims=True)                     # (C, 1)
            ssq = jnp.sum(ym * ym, axis=1, keepdims=True)                 # (C, 1)
            mean = ssum * inv_nhw
            var = ssq * inv_nhw - mean * mean
            scale = gamma * jax.lax.rsqrt(var + EPS)                      # (C, 1)
            shift = beta - mean * scale                                   # (C, 1)
            return jnp.maximum(y * scale + shift, 0.0)

        # conv1 -> BN1 -> ReLU; masked so every non-valid lane stored to the padded h1
        # grid is exactly zero (the zero padding conv2 relies on).
        h1 = bn_relu(conv3x3(xp_ref, w1_ref), g1_ref[...], b1_ref[...]) * mask
        h1p_ref[:, base:base + Lp] = h1

        # conv2 -> BN2 -> ReLU
        h2 = bn_relu(conv3x3(h1p_ref, w2_ref), g2_ref[...], b2_ref[...])

        # residual add + final ReLU; (C, Lp) output store is fully lane-dense.
        o_ref[...] = jnp.maximum(h2 + xp_ref[:, base:base + Lp], 0.0).astype(o_ref.dtype)

    vmem = pl.BlockSpec(memory_space=pltpu.MemorySpace.VMEM)
    out_flat = pl.pallas_call(
        kernel,
        out_shape=jax.ShapeDtypeStruct((C, Lp), jnp.float32),
        in_specs=[vmem] * 8,
        out_specs=vmem,
        scratch_shapes=[pltpu.VMEM((C, Sp_pad), jnp.float32),        # padded h1 grid
                        pltpu.VMEM((9 * Cpad, Lp), jnp.bfloat16)],   # im2col patches
        compiler_params=pltpu.CompilerParams(vmem_limit_bytes=32 * 1024 * 1024),
    )(xpad_flat, mask_l, w1m, g1c, b1c, w2m, g2c, b2c)

    # ---- wrapper-side un-plumbing: drop dead lanes, re-embed, take interior, NCHW ----
    out_pad = jnp.pad(out_flat[:, :L], ((0, 0), (base, Sp - base - L)))   # (C, Sp)
    out = out_pad.reshape(C, N, Hp, Wp)[:, :, 1:H + 1, 1:W + 1]           # (C, N, H, W)
    return jnp.transpose(out, (1, 0, 2, 3))                               # (N, C, H, W)


def reference_forward(x_nchw, w1, g1, b1, w2, g2, b2):
    """Pure-JAX f32 reference with identical semantics (for validation)."""
    def conv(xh, w):
        return jax.lax.conv_general_dilated(
            xh, w, window_strides=(1, 1), padding="SAME",
            dimension_numbers=("NHWC", "HWIO", "NHWC"))

    def bn_relu(y, g, b):
        mean = jnp.mean(y, axis=(0, 1, 2), keepdims=True)
        var = jnp.mean((y - mean) ** 2, axis=(0, 1, 2), keepdims=True)
        yhat = (y - mean) / jnp.sqrt(var + EPS)
        return jnp.maximum(yhat * g.reshape(1, 1, 1, -1) + b.reshape(1, 1, 1, -1), 0.0)

    x = jnp.transpose(x_nchw, (0, 2, 3, 1))
    h = bn_relu(conv(x, w1), g1, b1)
    h = bn_relu(conv(h, w2), g2, b2)
    out = jnp.maximum(h + x, 0.0)
    return jnp.transpose(out, (0, 3, 1, 2))


if __name__ == "__main__":
    # Residual add requires in_channel == out_channel.
    N, C, H, W = 2, 4, 16, 16

    key = jax.random.PRNGKey(0)
    kx, kw1, kw2 = jax.random.split(key, 3)

    x = jax.random.normal(kx, (N, C, H, W), dtype=jnp.float32)

    # Conv weights, deterministic init, stored as (kh, kw, Cin, Cout), no bias.
    fan_in = C * 3 * 3
    w1 = jax.random.normal(kw1, (3, 3, C, C), dtype=jnp.float32) / jnp.sqrt(fan_in)
    w2 = jax.random.normal(kw2, (3, 3, C, C), dtype=jnp.float32) / jnp.sqrt(fan_in)

    # BatchNorm affine params: PyTorch defaults (gamma=1, beta=0).
    g1 = jnp.ones((C,), jnp.float32)
    b1 = jnp.zeros((C,), jnp.float32)
    g2 = jnp.ones((C,), jnp.float32)
    b2 = jnp.zeros((C,), jnp.float32)

    out = residual_block(x, w1, g1, b1, w2, g2, b2)
    out = jax.block_until_ready(out)

    ref = reference_forward(x, w1, g1, b1, w2, g2, b2)
    ref = jax.block_until_ready(ref)

    assert out.shape == (N, C, H, W) and out.dtype == jnp.float32
    # Tolerance loosened vs. the pure-f32 version because the MXU operands are bf16
    # (f32 accumulation, f32 BN); observed error is well inside this bound.
    assert jnp.allclose(out, ref, rtol=2e-2, atol=2e-2), (
        f"max abs err = {jnp.max(jnp.abs(out - ref))}")

    print("KERNEL_OK")
</pallas_src>

<mosaic_0001>
module attributes {stable_mosaic.version = 11 : i64} {
  func.func @kernel(%arg0: memref<4x768xf32, #tpu.memory_space<vmem>>, %arg1: memref<1x640xf32, #tpu.memory_space<vmem>>, %arg2: memref<4x72xbf16, #tpu.memory_space<vmem>>, %arg3: memref<4x1xf32, #tpu.memory_space<vmem>>, %arg4: memref<4x1xf32, #tpu.memory_space<vmem>>, %arg5: memref<4x72xbf16, #tpu.memory_space<vmem>>, %arg6: memref<4x1xf32, #tpu.memory_space<vmem>>, %arg7: memref<4x1xf32, #tpu.memory_space<vmem>>, %arg8: memref<4x640xf32, #tpu.memory_space<vmem>>, %arg9: memref<4x768xf32, #tpu.memory_space<vmem>>, %arg10: memref<72x640xbf16, #tpu.memory_space<vmem>>) attributes {dimension_semantics = [], scalar_prefetch = 0 : i64, scratch_operands = 2 : i64, tpu.core_type = #tpu.core_type<tc>} {
    %c0 = arith.constant 0 : index
    %c0_0 = arith.constant 0 : index
    %0 = vector.load %arg1[%c0, %c0_0] : memref<1x640xf32, #tpu.memory_space<vmem>>, vector<1x640xf32>
    %cst = arith.constant 0.000000e+00 : bf16
    %1 = vector.broadcast %cst : bf16 to vector<72x640xbf16>
    %c0_1 = arith.constant 0 : index
    %c0_2 = arith.constant 0 : index
    %2 = vector.load %arg10[%c0_1, %c0_2] : memref<72x640xbf16, #tpu.memory_space<vmem>>, vector<72x640xbf16>
    tpu.vector_store %arg10[%c0_1, %c0_2], %1 {strides = array<i32>} : memref<72x640xbf16, #tpu.memory_space<vmem>>, vector<72x640xbf16>,
    %cst_3 = arith.constant 0.000000e+00 : f32
    %3 = vector.broadcast %cst_3 : f32 to vector<4x19xf32>
    %c0_4 = arith.constant 0 : index
    %c0_5 = arith.constant 0 : index
    %4 = vector.load %arg9[%c0_4, %c0_5] : memref<4x768xf32, #tpu.memory_space<vmem>>, vector<4x19xf32>
    tpu.vector_store %arg9[%c0_4, %c0_5], %3 {strides = array<i32>} : memref<4x768xf32, #tpu.memory_space<vmem>>, vector<4x19xf32>,
    %cst_6 = arith.constant 0.000000e+00 : f32
    %5 = vector.broadcast %cst_6 : f32 to vector<4x109xf32>
    %c0_7 = arith.constant 0 : index
    %c659 = arith.constant 659 : index
    %6 = vector.load %arg9[%c0_7, %c659] : memref<4x768xf32, #tpu.memory_space<vmem>>, vector<4x109xf32>
    tpu.vector_store %arg9[%c0_7, %c659], %5 {strides = array<i32>} : memref<4x768xf32, #tpu.memory_space<vmem>>, vector<4x109xf32>,
    %c0_8 = arith.constant 0 : index
    %c0_9 = arith.constant 0 : index
    %7 = vector.load %arg0[%c0_8, %c0_9] : memref<4x768xf32, #tpu.memory_space<vmem>>, vector<4x642xf32>
    %8 = arith.truncf %7 : vector<4x642xf32> to vector<4x642xbf16>
    %9 = vector.extract_strided_slice %8 {offsets = [0, 0], sizes = [4, 640], strides = [1, 1]} : vector<4x642xbf16> to vector<4x640xbf16>
    %c0_10 = arith.constant 0 : index
    %c0_11 = arith.constant 0 : index
    %10 = vector.load %arg10[%c0_10, %c0_11] : memref<72x640xbf16, #tpu.memory_space<vmem>>, vector<4x640xbf16>
    tpu.vector_store %arg10[%c0_10, %c0_11], %9 {strides = array<i32>} : memref<72x640xbf16, #tpu.memory_space<vmem>>, vector<4x640xbf16>,
    %11 = vector.extract_strided_slice %8 {offsets = [0, 1], sizes = [4, 640], strides = [1, 1]} : vector<4x642xbf16> to vector<4x640xbf16>
    %c8 = arith.constant 8 : index
    %c0_12 = arith.constant 0 : index
    %12 = vector.load %arg10[%c8, %c0_12] : memref<72x640xbf16, #tpu.memory_space<vmem>>, vector<4x640xbf16>
    tpu.vector_store %arg10[%c8, %c0_12], %11 {strides = array<i32>} : memref<72x640xbf16, #tpu.memory_space<vmem>>, vector<4x640xbf16>,
    %13 = vector.extract_strided_slice %8 {offsets = [0, 2], sizes = [4, 640], strides = [1, 1]} : vector<4x642xbf16> to vector<4x640xbf16>
    %c16 = arith.constant 16 : index
    %c0_13 = arith.constant 0 : index
    %14 = vector.load %arg10[%c16, %c0_13] : memref<72x640xbf16, #tpu.memory_space<vmem>>, vector<4x640xbf16>
    tpu.vector_store %arg10[%c16, %c0_13], %13 {strides = array<i32>} : memref<72x640xbf16, #tpu.memory_space<vmem>>, vector<4x640xbf16>,
    %c0_14 = arith.constant 0 : index
    %c18 = arith.constant 18 : index
    %15 = vector.load %arg0[%c0_14, %c18] : memref<4x768xf32, #tpu.memory_space<vmem>>, vector<4x642xf32>
    %16 = arith.truncf %15 : vector<4x642xf32> to vector<4x642xbf16>
    %17 = vector.extract_strided_slice %16 {offsets = [0, 0], sizes = [4, 640], strides = [1, 1]} : vector<4x642xbf16> to vector<4x640xbf16>
    %c24 = arith.constant 24 : index
    %c0_15 = arith.constant 0 : index
    %18 = vector.load %arg10[%c24, %c0_15] : memref<72x640xbf16, #tpu.memory_space<vmem>>, vector<4x640xbf16>
    tpu.vector_store %arg10[%c24, %c0_15], %17 {strides = array<i32>} : memref<72x640xbf16, #tpu.memory_space<vmem>>, vector<4x640xbf16>,
    %19 = vector.extract_strided_slice %16 {offsets = [0, 1], sizes = [4, 640], strides = [1, 1]} : vector<4x642xbf16> to vector<4x640xbf16>
    %c32 = arith.constant 32 : index
    %c0_16 = arith.constant 0 : index
    %20 = vector.load %arg10[%c32, %c0_16] : memref<72x640xbf16, #tpu.memory_space<vmem>>, vector<4x640xbf16>
    tpu.vector_store %arg10[%c32, %c0_16], %19 {strides = array<i32>} : memref<72x640xbf16, #tpu.memory_space<vmem>>, vector<4x640xbf16>,
    %21 = vector.extract_strided_slice %16 {offsets = [0, 2], sizes = [4, 640], strides = [1, 1]} : vector<4x642xbf16> to vector<4x640xbf16>
    %c40 = arith.constant 40 : index
    %c0_17 = arith.constant 0 : index
    %22 = vector.load %arg10[%c40, %c0_17] : memref<72x640xbf16, #tpu.memory_space<vmem>>, vector<4x640xbf16>
    tpu.vector_store %arg10[%c40, %c0_17], %21 {strides = array<i32>} : memref<72x640xbf16, #tpu.memory_space<vmem>>, vector<4x640xbf16>,
    %c0_18 = arith.constant 0 : index
    %c36 = arith.constant 36 : index
    %23 = vector.load %arg0[%c0_18, %c36] : memref<4x768xf32, #tpu.memory_space<vmem>>, vector<4x642xf32>
    %24 = arith.truncf %23 : vector<4x642xf32> to vector<4x642xbf16>
    %25 = vector.extract_strided_slice %24 {offsets = [0, 0], sizes = [4, 640], strides = [1, 1]} : vector<4x642xbf16> to vector<4x640xbf16>
    %c48 = arith.constant 48 : index
    %c0_19 = arith.constant 0 : index
    %26 = vector.load %arg10[%c48, %c0_19] : memref<72x640xbf16, #tpu.memory_space<vmem>>, vector<4x640xbf16>
    tpu.vector_store %arg10[%c48, %c0_19], %25 {strides = array<i32>} : memref<72x640xbf16, #tpu.memory_space<vmem>>, vector<4x640xbf16>,
    %27 = vector.extract_strided_slice %24 {offsets = [0, 1], sizes = [4, 640], strides = [1, 1]} : vector<4x642xbf16> to vector<4x640xbf16>
    %c56 = arith.constant 56 : index
    %c0_20 = arith.constant 0 : index
    %28 = vector.load %arg10[%c56, %c0_20] : memref<72x640xbf16, #tpu.memory_space<vmem>>, vector<4x640xbf16>
    tpu.vector_store %arg10[%c56, %c0_20], %27 {strides = array<i32>} : memref<72x640xbf16, #tpu.memory_space<vmem>>, vector<4x640xbf16>,
    %29 = vector.extract_strided_slice %24 {offsets = [0, 2], sizes = [4, 640], strides = [1, 1]} : vector<4x642xbf16> to vector<4x640xbf16>
    %c64 = arith.constant 64 : index
    %c0_21 = arith.constant 0 : index
    %30 = vector.load %arg10[%c64, %c0_21] : memref<72x640xbf16, #tpu.memory_space<vmem>>, vector<4x640xbf16>
    tpu.vector_store %arg10[%c64, %c0_21], %29 {strides = array<i32>} : memref<72x640xbf16, #tpu.memory_space<vmem>>, vector<4x640xbf16>,
    %c0_22 = arith.constant 0 : index
    %c0_23 = arith.constant 0 : index
    %31 = vector.load %arg2[%c0_22, %c0_23] : memref<4x72xbf16, #tpu.memory_space<vmem>>, vector<4x72xbf16>
    %c0_24 = arith.constant 0 : index
    %c0_25 = arith.constant 0 : index
    %32 = vector.load %arg10[%c0_24, %c0_25] : memref<72x640xbf16, #tpu.memory_space<vmem>>, vector<72x640xbf16>
    %cst_26 = arith.constant dense<0.000000e+00> : vector<4x640xf32>
    %33 = tpu.matmul %31, %32, %cst_26 {dimension_numbers = #tpu.dot_dimension_numbers<[1], [0], [0], [1], [0, 0, 1, 1], [], []>} : vector<4x72xbf16>, vector<72x640xbf16>, vector<4x640xf32> -> vector<4x640xf32>
    %c0_27 = arith.constant 0 : index
    %c0_28 = arith.constant 0 : index
    %34 = vector.load %arg3[%c0_27, %c0_28] : memref<4x1xf32, #tpu.memory_space<vmem>>, vector<4x1xf32>
    %c0_29 = arith.constant 0 : index
    %c0_30 = arith.constant 0 : index
    %35 = vector.load %arg4[%c0_29, %c0_30] : memref<4x1xf32, #tpu.memory_space<vmem>>, vector<4x1xf32>
    %36 = vector.broadcast %0 : vector<1x640xf32> to vector<4x640xf32>
    %37 = arith.mulf %33, %36 : vector<4x640xf32>
    %cst_31 = arith.constant dense<0.000000e+00> : vector<4xf32>
    %38 = vector.multi_reduction <add>, %37, %cst_31 [1] : vector<4x640xf32> to vector<4xf32>
    %39 = vector.shape_cast %38 : vector<4xf32> to vector<4x1xf32>
    %40 = arith.mulf %37, %37 : vector<4x640xf32>
    %cst_32 = arith.constant dense<0.000000e+00> : vector<4xf32>
    %41 = vector.multi_reduction <add>, %40, %cst_32 [1] : vector<4x640xf32> to vector<4xf32>
    %42 = vector.shape_cast %41 : vector<4xf32> to vector<4x1xf32>
    %cst_33 = arith.constant 0.001953125 : f32
    %43 = vector.broadcast %cst_33 : f32 to vector<4x1xf32>
    %44 = arith.mulf %39, %43 : vector<4x1xf32>
    %cst_34 = arith.constant 0.001953125 : f32
    %45 = vector.broadcast %cst_34 : f32 to vector<4x1xf32>
    %46 = arith.mulf %42, %45 : vector<4x1xf32>
    %47 = arith.mulf %44, %44 : vector<4x1xf32>
    %48 = arith.subf %46, %47 : vector<4x1xf32>
    %cst_35 = arith.constant 9.99999974E-6 : f32
    %49 = vector.broadcast %cst_35 : f32 to vector<4x1xf32>
    %50 = arith.addf %48, %49 : vector<4x1xf32>
    %51 = math.rsqrt %50 : vector<4x1xf32>
    %52 = arith.mulf %34, %51 : vector<4x1xf32>
    %53 = arith.mulf %44, %52 : vector<4x1xf32>
    %54 = arith.subf %35, %53 : vector<4x1xf32>
    %55 = vector.broadcast %52 : vector<4x1xf32> to vector<4x640xf32>
    %56 = arith.mulf %33, %55 : vector<4x640xf32>
    %57 = vector.broadcast %54 : vector<4x1xf32> to vector<4x640xf32>
    %58 = arith.addf %56, %57 : vector<4x640xf32>
    %cst_36 = arith.constant 0.000000e+00 : f32
    %59 = vector.broadcast %cst_36 : f32 to vector<4x640xf32>
    %60 = arith.maximumf %58, %59 : vector<4x640xf32>
    %61 = vector.broadcast %0 : vector<1x640xf32> to vector<4x640xf32>
    %62 = arith.mulf %60, %61 : vector<4x640xf32>
    %c0_37 = arith.constant 0 : index
    %c19 = arith.constant 19 : index
    %63 = vector.load %arg9[%c0_37, %c19] : memref<4x768xf32, #tpu.memory_space<vmem>>, vector<4x640xf32>
    tpu.vector_store %arg9[%c0_37, %c19], %62 {strides = array<i32>} : memref<4x768xf32, #tpu.memory_space<vmem>>, vector<4x640xf32>,
    %c0_38 = arith.constant 0 : index
    %c0_39 = arith.constant 0 : index
    %64 = vector.load %arg9[%c0_38, %c0_39] : memref<4x768xf32, #tpu.memory_space<vmem>>, vector<4x642xf32>
    %65 = arith.truncf %64 : vector<4x642xf32> to vector<4x642xbf16>
    %66 = vector.extract_strided_slice %65 {offsets = [0, 0], sizes = [4, 640], strides = [1, 1]} : vector<4x642xbf16> to vector<4x640xbf16>
    %c0_40 = arith.constant 0 : index
    %c0_41 = arith.constant 0 : index
    %67 = vector.load %arg10[%c0_40, %c0_41] : memref<72x640xbf16, #tpu.memory_space<vmem>>, vector<4x640xbf16>
    tpu.vector_store %arg10[%c0_40, %c0_41], %66 {strides = array<i32>} : memref<72x640xbf16, #tpu.memory_space<vmem>>, vector<4x640xbf16>,
    %68 = vector.extract_strided_slice %65 {offsets = [0, 1], sizes = [4, 640], strides = [1, 1]} : vector<4x642xbf16> to vector<4x640xbf16>
    %c8_42 = arith.constant 8 : index
    %c0_43 = arith.constant 0 : index
    %69 = vector.load %arg10[%c8_42, %c0_43] : memref<72x640xbf16, #tpu.memory_space<vmem>>, vector<4x640xbf16>
    tpu.vector_store %arg10[%c8_42, %c0_43], %68 {strides = array<i32>} : memref<72x640xbf16, #tpu.memory_space<vmem>>, vector<4x640xbf16>,
    %70 = vector.extract_strided_slice %65 {offsets = [0, 2], sizes = [4, 640], strides = [1, 1]} : vector<4x642xbf16> to vector<4x640xbf16>
    %c16_44 = arith.constant 16 : index
    %c0_45 = arith.constant 0 : index
    %71 = vector.load %arg10[%c16_44, %c0_45] : memref<72x640xbf16, #tpu.memory_space<vmem>>, vector<4x640xbf16>
    tpu.vector_store %arg10[%c16_44, %c0_45], %70 {strides = array<i32>} : memref<72x640xbf16, #tpu.memory_space<vmem>>, vector<4x640xbf16>,
    %c0_46 = arith.constant 0 : index
    %c18_47 = arith.constant 18 : index
    %72 = vector.load %arg9[%c0_46, %c18_47] : memref<4x768xf32, #tpu.memory_space<vmem>>, vector<4x642xf32>
    %73 = arith.truncf %72 : vector<4x642xf32> to vector<4x642xbf16>
    %74 = vector.extract_strided_slice %73 {offsets = [0, 0], sizes = [4, 640], strides = [1, 1]} : vector<4x642xbf16> to vector<4x640xbf16>
    %c24_48 = arith.constant 24 : index
    %c0_49 = arith.constant 0 : index
    %75 = vector.load %arg10[%c24_48, %c0_49] : memref<72x640xbf16, #tpu.memory_space<vmem>>, vector<4x640xbf16>
    tpu.vector_store %arg10[%c24_48, %c0_49], %74 {strides = array<i32>} : memref<72x640xbf16, #tpu.memory_space<vmem>>, vector<4x640xbf16>,
    %76 = vector.extract_strided_slice %73 {offsets = [0, 1], sizes = [4, 640], strides = [1, 1]} : vector<4x642xbf16> to vector<4x640xbf16>
    %c32_50 = arith.constant 32 : index
    %c0_51 = arith.constant 0 : index
    %77 = vector.load %arg10[%c32_50, %c0_51] : memref<72x640xbf16, #tpu.memory_space<vmem>>, vector<4x640xbf16>
    tpu.vector_store %arg10[%c32_50, %c0_51], %76 {strides = array<i32>} : memref<72x640xbf16, #tpu.memory_space<vmem>>, vector<4x640xbf16>,
    %78 = vector.extract_strided_slice %73 {offsets = [0, 2], sizes = [4, 640], strides = [1, 1]} : vector<4x642xbf16> to vector<4x640xbf16>
    %c40_52 = arith.constant 40 : index
    %c0_53 = arith.constant 0 : index
    %79 = vector.load %arg10[%c40_52, %c0_53] : memref<72x640xbf16, #tpu.memory_space<vmem>>, vector<4x640xbf16>
    tpu.vector_store %arg10[%c40_52, %c0_53], %78 {strides = array<i32>} : memref<72x640xbf16, #tpu.memory_space<vmem>>, vector<4x640xbf16>,
    %c0_54 = arith.constant 0 : index
    %c36_55 = arith.constant 36 : index
    %80 = vector.load %arg9[%c0_54, %c36_55] : memref<4x768xf32, #tpu.memory_space<vmem>>, vector<4x642xf32>
    %81 = arith.truncf %80 : vector<4x642xf32> to vector<4x642xbf16>
    %82 = vector.extract_strided_slice %81 {offsets = [0, 0], sizes = [4, 640], strides = [1, 1]} : vector<4x642xbf16> to vector<4x640xbf16>
    %c48_56 = arith.constant 48 : index
    %c0_57 = arith.constant 0 : index
    %83 = vector.load %arg10[%c48_56, %c0_57] : memref<72x640xbf16, #tpu.memory_space<vmem>>, vector<4x640xbf16>
    tpu.vector_store %arg10[%c48_56, %c0_57], %82 {strides = array<i32>} : memref<72x640xbf16, #tpu.memory_space<vmem>>, vector<4x640xbf16>,
    %84 = vector.extract_strided_slice %81 {offsets = [0, 1], sizes = [4, 640], strides = [1, 1]} : vector<4x642xbf16> to vector<4x640xbf16>
    %c56_58 = arith.constant 56 : index
    %c0_59 = arith.constant 0 : index
    %85 = vector.load %arg10[%c56_58, %c0_59] : memref<72x640xbf16, #tpu.memory_space<vmem>>, vector<4x640xbf16>
    tpu.vector_store %arg10[%c56_58, %c0_59], %84 {strides = array<i32>} : memref<72x640xbf16, #tpu.memory_space<vmem>>, vector<4x640xbf16>,
    %86 = vector.extract_strided_slice %81 {offsets = [0, 2], sizes = [4, 640], strides = [1, 1]} : vector<4x642xbf16> to vector<4x640xbf16>
    %c64_60 = arith.constant 64 : index
    %c0_61 = arith.constant 0 : index
    %87 = vector.load %arg10[%c64_60, %c0_61] : memref<72x640xbf16, #tpu.memory_space<vmem>>, vector<4x640xbf16>
    tpu.vector_store %arg10[%c64_60, %c0_61], %86 {strides = array<i32>} : memref<72x640xbf16, #tpu.memory_space<vmem>>, vector<4x640xbf16>,
    %c0_62 = arith.constant 0 : index
    %c0_63 = arith.constant 0 : index
    %88 = vector.load %arg5[%c0_62, %c0_63] : memref<4x72xbf16, #tpu.memory_space<vmem>>, vector<4x72xbf16>
    %c0_64 = arith.constant 0 : index
    %c0_65 = arith.constant 0 : index
    %89 = vector.load %arg10[%c0_64, %c0_65] : memref<72x640xbf16, #tpu.memory_space<vmem>>, vector<72x640xbf16>
    %cst_66 = arith.constant dense<0.000000e+00> : vector<4x640xf32>
    %90 = tpu.matmul %88, %89, %cst_66 {dimension_numbers = #tpu.dot_dimension_numbers<[1], [0], [0], [1], [0, 0, 1, 1], [], []>} : vector<4x72xbf16>, vector<72x640xbf16>, vector<4x640xf32> -> vector<4x640xf32>
    %c0_67 = arith.constant 0 : index
    %c0_68 = arith.constant 0 : index
    %91 = vector.load %arg6[%c0_67, %c0_68] : memref<4x1xf32, #tpu.memory_space<vmem>>, vector<4x1xf32>
    %c0_69 = arith.constant 0 : index
    %c0_70 = arith.constant 0 : index
    %92 = vector.load %arg7[%c0_69, %c0_70] : memref<4x1xf32, #tpu.memory_space<vmem>>, vector<4x1xf32>
    %93 = vector.broadcast %0 : vector<1x640xf32> to vector<4x640xf32>
    %94 = arith.mulf %90, %93 : vector<4x640xf32>
    %cst_71 = arith.constant dense<0.000000e+00> : vector<4xf32>
    %95 = vector.multi_reduction <add>, %94, %cst_71 [1] : vector<4x640xf32> to vector<4xf32>
    %96 = vector.shape_cast %95 : vector<4xf32> to vector<4x1xf32>
    %97 = arith.mulf %94, %94 : vector<4x640xf32>
    %cst_72 = arith.constant dense<0.000000e+00> : vector<4xf32>
    %98 = vector.multi_reduction <add>, %97, %cst_72 [1] : vector<4x640xf32> to vector<4xf32>
    %99 = vector.shape_cast %98 : vector<4xf32> to vector<4x1xf32>
    %cst_73 = arith.constant 0.001953125 : f32
    %100 = vector.broadcast %cst_73 : f32 to vector<4x1xf32>
    %101 = arith.mulf %96, %100 : vector<4x1xf32>
    %cst_74 = arith.constant 0.001953125 : f32
    %102 = vector.broadcast %cst_74 : f32 to vector<4x1xf32>
    %103 = arith.mulf %99, %102 : vector<4x1xf32>
    %104 = arith.mulf %101, %101 : vector<4x1xf32>
    %105 = arith.subf %103, %104 : vector<4x1xf32>
    %cst_75 = arith.constant 9.99999974E-6 : f32
    %106 = vector.broadcast %cst_75 : f32 to vector<4x1xf32>
    %107 = arith.addf %105, %106 : vector<4x1xf32>
    %108 = math.rsqrt %107 : vector<4x1xf32>
    %109 = arith.mulf %91, %108 : vector<4x1xf32>
    %110 = arith.mulf %101, %109 : vector<4x1xf32>
    %111 = arith.subf %92, %110 : vector<4x1xf32>
    %112 = vector.broadcast %109 : vector<4x1xf32> to vector<4x640xf32>
    %113 = arith.mulf %90, %112 : vector<4x640xf32>
    %114 = vector.broadcast %111 : vector<4x1xf32> to vector<4x640xf32>
    %115 = arith.addf %113, %114 : vector<4x640xf32>
    %cst_76 = arith.constant 0.000000e+00 : f32
    %116 = vector.broadcast %cst_76 : f32 to vector<4x640xf32>
    %117 = arith.maximumf %115, %116 : vector<4x640xf32>
    %c0_77 = arith.constant 0 : index
    %c19_78 = arith.constant 19 : index
    %118 = vector.load %arg0[%c0_77, %c19_78] : memref<4x768xf32, #tpu.memory_space<vmem>>, vector<4x640xf32>
    %119 = arith.addf %117, %118 : vector<4x640xf32>
    %cst_79 = arith.constant 0.000000e+00 : f32
    %120 = vector.broadcast %cst_79 : f32 to vector<4x640xf32>
    %121 = arith.maximumf %119, %120 : vector<4x640xf32>
    %c0_80 = arith.constant 0 : index
    %c0_81 = arith.constant 0 : index
    %122 = vector.load %arg8[%c0_80, %c0_81] : memref<4x640xf32, #tpu.memory_space<vmem>>, vector<4x640xf32>
    tpu.vector_store %arg8[%c0_80, %c0_81], %121 {strides = array<i32>} : memref<4x640xf32, #tpu.memory_space<vmem>>, vector<4x640xf32>,
    return
  }
}

</mosaic_0001>

<bundles_post_ra>
// kernel: tpu_custom_call.1
= control target key start
LH: loop header
LB: loop body
LE: loop exit
PB: predicated region body
PF: predicated region fallthrough
CT: control target
= control target key end

     0   :  { %13 = vsyncpa [#allocation5], 0  ;;  %s1999_s0 = inlined_call_operand.hbm [shape: f32[4,768], index: 0, kind: input, shape index: {}]   ;;  %s2000_s1 = inlined_call_operand.vmem [shape: f32[1,640], index: 1, kind: input, shape index: {}]   ;;  %s2001_s2 = inlined_call_operand.vmem [shape: bf16[4,72], index: 2, kind: input, shape index: {}]   ;;  %s2002_s3 = inlined_call_operand.vmem [shape: f32[4,1], index: 3, kind: input, shape index: {}]   ;;  %s2003_s4 = inlined_call_operand.vmem [shape: f32[4,1], index: 4, kind: input, shape index: {}]   ;;  %s2004_s5 = inlined_call_operand.vmem [shape: bf16[4,72], index: 5, kind: input, shape index: {}]   ;;  %s2005_s6 = inlined_call_operand.vmem [shape: f32[4,1], index: 6, kind: input, shape index: {}]   ;;  %s2006_s7 = inlined_call_operand.vmem [shape: f32[4,1], index: 7, kind: input, shape index: {}]   ;;  %s2007_s8 = inlined_call_operand.hbm [shape: f32[4,640], index: 8, kind: output, shape index: {}]  }
   0x1   :  { %14 = vsyncpa [#allocation6], 0  ;;  %s20_s29 = sshll.u32 %s1999_s0, 4  ;;  %s1609_s30 = smov [#allocation4]   ;;  %s21_s29 = int_to_ptr.hbm [resolvable:$true] %s20_s29 }
   0x2   :  { %s22_s9 = sshll.u32 %s1609_s30, 4  ;;  %s23_s9 = int_to_ptr.vmem [resolvable:$true] %s22_s9 }
   0x3   :  { %25 = dma.hbm_to_vmem [thread:$0]  %s21_s29, 384, %s23_s9, [#allocation5]  }
   0x4   :  { %1605 = dma.done.wait [#allocation5], 384  }
   0x5   :  { %1606 = vsyncadd [#allocation5], 4294966912  ;;  %v1610_v0 = vmov 0   ;;  %v77_v1 = vld [vmem:[#allocation4] sm:$0xff]  ;;  %s1611_s0 = smov 126   ;;  %s1612_s10 = smov 108  }
   0x6   :  { %46 = vst [vmem:[#allocation3] sm:$0xff] %v1610_v0  ;;  %1551 = vset.pattern.permute.xlu2 %v1610_v0  ;;  %1552 = vset.pattern.permute.xlu0 %v1610_v0  ;;  %s1613_s11 = smov 109   ;;  %v78_v8 = vld [vmem:[#allocation4 + $0x8] sm:$0xff]  ;;  %v79_v9 = vld [vmem:[#allocation4 + $0x10] sm:$0xff]  ;;  %s1614_s12 = smov 90   ;;  %vm118_vm0 = vcmask 1043456  }
   0x7   :  { %47 = vst [vmem:[#allocation3 + $0x8] sm:$0xff] %v1610_v0  ;;  %s1615_s13 = smov 92   ;;  %s1616_s14 = smov 91   ;;  %vm141_vm1 = vcmask 1031168   ;;  %vm212_vm2 = vcmask 891904   ;;  %vm283_vm3 = vcmask 752640  }
   0x8   :  { %48 = vst [vmem:[#allocation3 + $0x10] sm:$0xf] %v1610_v0  ;;  %s1617_s15 = smov 110   ;;  %s1618_s16 = smov 127   ;;  %vm233_vm4 = vcmask 883712   ;;  %vm325_vm5 = vcmask 736256  }
   0x9   :  { %49 = vst [vmem:[#allocation3 + $0x14] sm:$0xff] %v1610_v0  ;;  %vm304_vm6 = vcmask 744448   ;;  %vm120_vm7 = vcmask 1039360   ;;  %vm191_vm8 = vcmask 900096   ;;  %vm481_vm9 = vcmask 588800   ;;  %s1318_s29 = sshll.u32 %s2007_s8, 4  ;;  %s1319_s29 = int_to_ptr.hbm [resolvable:$true] %s1318_s29 }
   0xa   :  { %50 = vst [vmem:[#allocation3 + $0x1c] sm:$0xff] %v1610_v0  ;;  %vm73_vm13 = vcmask 150528   ;;  %vm75_vm14 = vcmask 1043608   ;;  %vm686_vm15 = vcmask 1047556  }
   0xb   :  { %51 = vst [vmem:[#allocation3 + $0x24] sm:$0xf] %v1610_v0 }
   0xc   :  { %52 = vst [vmem:[#allocation3 + $0x28] sm:$0xff] %v1610_v0 }
   0xd   :  { %83 = vst [vmem:[#allocation1] ss:$2 sm:$0xff] %v77_v1 }
   0xe   :  { %53 = vst [vmem:[#allocation3 + $0x30] sm:$0xff] %v1610_v0 }
   0xf   :  { %54 = vst [vmem:[#allocation3 + $0x38] sm:$0xf] %v1610_v0 }
  0x10   :  { %55 = vst [vmem:[#allocation3 + $0x3c] sm:$0xff] %v1610_v0 }
  0x11   :  { %56 = vst [vmem:[#allocation3 + $0x44] sm:$0xff] %v1610_v0 }
  0x12   :  { %57 = vst [vmem:[#allocation3 + $0x4c] sm:$0xf] %v1610_v0 }
  0x13   :  { %58 = vst [vmem:[#allocation3 + $0x50] sm:$0xff] %v1610_v0 }
  0x14   :  { %v88_v2 = vld.sshfl [vmem:[#allocation1] sm:$0xff pattern:$0x75316420]  ;;  %v89_v3 = vld.sshfl [vmem:[#allocation1 + $0x8] sm:$0xff pattern:$0x75316420] }
  0x15   :  { %v1670_v4 = vpack.c.bf16 %v89_v3, %v88_v2  ;;  %158 = vst [vmem:[#allocation1] ss:$2 sm:$0xff] %v77_v1 }
  0x16   :  { %59 = vst [vmem:[#allocation3 + $0x58] sm:$0xff] %v1610_v0 }
  0x17   :  { %131 = vrot.lane.b32.xlu1 %v1670_v4, %s1611_s0  ;;  %103 = vst [vmem:[#allocation3] sm:$0x33] %v1670_v4 }
  0x18   :  { %60 = vst [vmem:[#allocation3 + $0x60] sm:$0xf] %v1610_v0 }
  0x19   :  { %61 = vst [vmem:[#allocation3 + $0x64] sm:$0xff] %v1610_v0 }
  0x1a   :  { %62 = vst [vmem:[#allocation3 + $0x6c] sm:$0xff] %v1610_v0 }
  0x1b   :  { %63 = vst [vmem:[#allocation3 + $0x74] sm:$0xf] %v1610_v0 }
  0x1c   :  { %64 = vst [vmem:[#allocation3 + $0x78] sm:$0xff] %v1610_v0  ;;  %v163_v5 = vld.sshfl [vmem:[#allocation1] sm:$0xff pattern:$0x75316420] }
  0x1d   :  { %65 = vst [vmem:[#allocation3 + $0x80] sm:$0xff] %v1610_v0  ;;  %v164_v6 = vld.sshfl [vmem:[#allocation1 + $0x8] sm:$0xff pattern:$0x75316420] }
  0x1e   :  { %66 = vst [vmem:[#allocation3 + $0x88] sm:$0xf] %v1610_v0  ;;  %v175_v7 = vpack.c.bf16 %v164_v6, %v163_v5 }
  0x1f   :  { %67 = vst [vmem:[#allocation3 + $0x8c] sm:$0xff] %v1610_v0 }
  0x20   :  { %68 = vst [vmem:[#allocation3 + $0x94] sm:$0xff] %v1610_v0  ;;  %223 = vrot.lane.b32.xlu0 %v175_v7, %s1612_s10  ;;  %202 = vrot.lane.b32.xlu1 %v175_v7, %s1613_s11 }
  0x21   :  { %69 = vst [vmem:[#allocation3 + $0x9c] sm:$0xf] %v1610_v0 }
  0x22   :  { %70 = vst [vmem:[#allocation3 + $0xa0] sm:$0xff] %v1610_v0 }
  0x23   :  { %71 = vst [vmem:[#allocation3 + $0xa8] sm:$0xff] %v1610_v0 }
  0x24   :  { %72 = vst [vmem:[#allocation3 + $0xb0] sm:$0xf] %v1610_v0 }
  0x25   :  { %85 = vst [vmem:[#allocation1 + $0x10] ss:$2 sm:$0xff] %v78_v8 }
  0x26   :  { %250 = vst [vmem:[#allocation1] ss:$2 sm:$0xff] %v77_v1 }
  0x27   :  { %87 = vst [vmem:[#allocation1 + $0x20] ss:$2 sm:$0xff] %v79_v9 }
  0x2c   :  { %v90_v10 = vld.sshfl [vmem:[#allocation1 + $0x10] sm:$0xff pattern:$0x75316420]  ;;  %v91_v11 = vld.sshfl [vmem:[#allocation1 + $0x18] sm:$0xff pattern:$0x75316420] }
  0x2d   :  { %v101_v12 = vpack.c.bf16 %v91_v11, %v90_v10  ;;  %160 = vst [vmem:[#allocation1 + $0x10] ss:$2 sm:$0xff] %v78_v8  ;;  %v255_v13 = vld.sshfl [vmem:[#allocation1] sm:$0xff pattern:$0x75316420] }
  0x2e   :  { %v256_v14 = vld.sshfl [vmem:[#allocation1 + $0x8] sm:$0xff pattern:$0x75316420]  ;;  %v92_v15 = vld.sshfl [vmem:[#allocation1 + $0x20] sm:$0xff pattern:$0x75316420] }
  0x2f   :  { %133 = vrot.lane.b32.xlu2 %v101_v12, %s1611_s0  ;;  %104 = vst [vmem:[#allocation3 + $0x8] sm:$0x33] %v101_v12  ;;  %v267_v16 = vpack.c.bf16 %v256_v14, %v255_v13  ;;  %v93_v17 = vld.sshfl [vmem:[#allocation1 + $0x28] sm:$0xff pattern:$0x75316420] }
  0x30   :  { %162 = vst [vmem:[#allocation1 + $0x20] ss:$2 sm:$0xff] %v79_v9  ;;  %v102_v29 = vpack.c.bf16 %v93_v17, %v92_v15 }
  0x31   :  { %315 = vrot.lane.b32.xlu0 %v267_v16, %s1614_s12 }
  0x32   :  { %105 = vst [vmem:[#allocation3 + $0x10] sm:$0x3] %v102_v29 }
  0x34   :  { %v165_v18 = vld.sshfl [vmem:[#allocation1 + $0x10] sm:$0xff pattern:$0x75316420]  ;;  %v166_v19 = vld.sshfl [vmem:[#allocation1 + $0x18] sm:$0xff pattern:$0x75316420] }
  0x35   :  { %v176_v20 = vpack.c.bf16 %v166_v19, %v165_v18  ;;  %252 = vst [vmem:[#allocation1 + $0x10] ss:$2 sm:$0xff] %v78_v8 }
  0x37   :  { %204 = vrot.lane.b32.xlu2 %v176_v20, %s1613_s11  ;;  %225 = vrot.lane.b32.xlu1 %v176_v20, %s1612_s10  ;;  %v167_v21 = vld.sshfl [vmem:[#allocation1 + $0x20] sm:$0xff pattern:$0x75316420]  ;;  %v168_v22 = vld.sshfl [vmem:[#allocation1 + $0x28] sm:$0xff pattern:$0x75316420] }
  0x38   :  { %254 = vst [vmem:[#allocation1 + $0x20] ss:$2 sm:$0xff] %v79_v9  ;;  %v177_v30 = vpack.c.bf16 %v168_v22, %v167_v21 }
  0x3c   :  { %v257_v23 = vld.sshfl [vmem:[#allocation1 + $0x10] sm:$0xff pattern:$0x75316420]  ;;  %v258_v24 = vld.sshfl [vmem:[#allocation1 + $0x18] sm:$0xff pattern:$0x75316420] }
  0x3d   :  { %v268_v25 = vpack.c.bf16 %v258_v24, %v257_v23 }
  0x3f   :  { %275 = vrot.lane.b32.xlu2 %v268_v25, %s1615_s13  ;;  %317 = vrot.lane.b32.xlu0 %v268_v25, %s1614_s12  ;;  %v259_v26 = vld.sshfl [vmem:[#allocation1 + $0x20] sm:$0xff pattern:$0x75316420]  ;;  %v260_v27 = vld.sshfl [vmem:[#allocation1 + $0x28] sm:$0xff pattern:$0x75316420] }
  0x40   :  { %v269_v28 = vpack.c.bf16 %v260_v27, %v259_v26 }
  0x42   :  { %319 = vrot.lane.b32.xlu1 %v269_v28, %s1614_s12 }
  0x47   :  { %294 = vrot.lane.b32.xlu2 %v267_v16, %s1616_s14  ;;  %296 = vrot.lane.b32.xlu0 %v268_v25, %s1616_s14 }
  0x4a   :  { %273 = vrot.lane.b32.xlu1 %v267_v16, %s1615_s13 }
  0x4f   :  { %277 = vrot.lane.b32.xlu2 %v269_v28, %s1615_s13  ;;  %298 = vrot.lane.b32.xlu0 %v269_v28, %s1616_s14 }
  0x52   :  { %183 = vrot.lane.b32.xlu1 %v176_v20, %s1617_s15 }
  0x57   :  { %206 = vrot.lane.b32.xlu2 %v177_v30, %s1613_s11  ;;  %181 = vrot.lane.b32.xlu0 %v175_v7, %s1617_s15 }
  0x5a   :  { %109 = vrot.lane.b32.xlu1 %v1670_v4, %s1618_s16 }
  0x5f   :  { %227 = vrot.lane.b32.xlu0 %v177_v30, %s1612_s10  ;;  %111 = vrot.lane.b32.xlu2 %v101_v12, %s1618_s16 }
  0x62   :  { %185 = vrot.lane.b32.xlu1 %v177_v30, %s1617_s15 }
  0x67   :  { %135 = vrot.lane.b32.xlu0 %v102_v29, %s1611_s0  ;;  %113 = vrot.lane.b32.xlu2 %v102_v29, %s1618_s16 }
  0x89   :  { %v1699_v31 = vpop.permute.xlu2 %133  ;;  %v132_v32 = vpop.permute.xlu1 %131 }
  0x8a   :  { %v138_v33 = vrot.slane %v1699_v31, 4  ;;  %v137_v34 = vrot.slane %v132_v32, 4 }
  0x8c   :  { %v140_v35 = vsel %vm118_vm0, %v137_v34, %v138_v33 }
  0x8d   :  { %v142_v36 = vsel %vm141_vm1, %v132_v32, %v140_v35 }
  0x8e   :  { %149 = vst [vmem:[#allocation3 + $0x28] sm:$0x33] %v142_v36 }
  0x91   :  { %v205_v37 = vpop.permute.xlu2 %204 }
  0x92   :  { %v209_v38 = vrot.slane %v205_v37, 4  ;;  %v203_v39 = vpop.permute.xlu1 %202  ;;  %v224_v44 = vpop.permute.xlu0 %223 }
  0x93   :  { %v208_v40 = vrot.slane %v203_v39, 4  ;;  %v229_v50 = vrot.slane %v224_v44, 4 }
  0x95   :  { %v211_v41 = vsel %vm118_vm0, %v208_v40, %v209_v38 }
  0x96   :  { %v213_v42 = vsel %vm212_vm2, %v203_v39, %v211_v41 }
  0x97   :  { %220 = vst [vmem:[#allocation3 + $0x50] sm:$0x33] %v213_v42 }
  0x99   :  { %v276_v43 = vpop.permute.xlu2 %275 }
  0x9a   :  { %v280_v47 = vrot.slane %v276_v43, 4 }
  0xa1   :  { %v295_v45 = vpop.permute.xlu2 %294 }
  0xa2   :  { %v300_v8 = vrot.slane %v295_v45, 4 }
  0xa3   :  { %v316_v46 = vpop.permute.xlu0 %315 }
  0xa4   :  { %v321_v60 = vrot.slane %v316_v46, 4 }
  0xa9   :  { %v278_v48 = vpop.permute.xlu2 %277  ;;  %v1708_v49 = vpop.permute.xlu1 %225 }
  0xaa   :  { %v281_v51 = vrot.slane %v278_v48, 4  ;;  %v230_v52 = vrot.slane %v1708_v49, 4 }
  0xac   :  { %v285_v53 = vsel %vm118_vm0, %v280_v47, %v281_v51  ;;  %v287_v54 = vsel %vm283_vm3, %v278_v48, %v281_v51  ;;  %v232_v55 = vsel %vm118_vm0, %v229_v50, %v230_v52 }
  0xad   :  { %v286_v56 = vsel %vm283_vm3, %v276_v43, %v285_v53  ;;  %293 = vst [vmem:[#allocation3 + $0x88] sm:$0x3] %v287_v54  ;;  %v234_v57 = vsel %vm233_vm4, %v224_v44, %v232_v55 }
  0xae   :  { %292 = vst [vmem:[#allocation3 + $0x80] sm:$0x33] %v286_v56 }
  0xaf   :  { %241 = vst [vmem:[#allocation3 + $0x64] sm:$0x33] %v234_v57 }
  0xb1   :  { %v207_v58 = vpop.permute.xlu2 %206  ;;  %v318_v59 = vpop.permute.xlu0 %317 }
  0xb2   :  { %v210_v61 = vrot.slane %v207_v58, 4  ;;  %v322_v62 = vrot.slane %v318_v59, 4 }
  0xb4   :  { %v214_v63 = vsel %vm118_vm0, %v209_v38, %v210_v61  ;;  %v216_v0 = vsel %vm212_vm2, %v207_v58, %v210_v61  ;;  %v324_v1 = vsel %vm118_vm0, %v321_v60, %v322_v62  ;;  %v320_v2 = vpop.permute.xlu1 %319  ;;  %v1370_v60 = vld [vmem:[#allocation3 + $0x50] sm:$0xf] }
  0xb5   :  { %v215_v3 = vsel %vm212_vm2, %v205_v37, %v214_v63  ;;  %222 = vst [vmem:[#allocation3 + $0x60] sm:$0x3] %v216_v0  ;;  %v326_v4 = vsel %vm325_vm5, %v316_v46, %v324_v1  ;;  %v323_v5 = vrot.slane %v320_v2, 4  ;;  %v1508_v63 = vld [vmem:[#allocation3 + $0x54] sm:$0xf] }
  0xb6   :  { %221 = vst [vmem:[#allocation3 + $0x58] sm:$0x33] %v215_v3  ;;  %v1510_v58 = vld [vmem:[#allocation3 + $0x60] sm:$0xf0]  ;;  %v1398_v0 = vld [vmem:[#allocation3 + $0x80] sm:$0xf] }
  0xb7   :  { %333 = vst [vmem:[#allocation3 + $0xa0] sm:$0x33] %v326_v4  ;;  %v327_v6 = vsel %vm118_vm0, %v322_v62, %v323_v5  ;;  %v329_v7 = vsel %vm325_vm5, %v320_v2, %v323_v5  ;;  %v1514_v1 = vld [vmem:[#allocation3 + $0x84] sm:$0xf]  ;;  %v1371_v4 = vor.u32 %v1510_v58, %v1370_v60 }
  0xb8   :  { %v328_v9 = vsel %vm325_vm5, %v318_v59, %v327_v6  ;;  %335 = vst [vmem:[#allocation3 + $0xb0] sm:$0x3] %v329_v7  ;;  %v1372_v59 = vld [vmem:[#allocation3 + $0x64] sm:$0xf0] }
  0xb9   :  { %334 = vst [vmem:[#allocation3 + $0xa8] sm:$0x33] %v328_v9  ;;  %v297_v10 = vpop.permute.xlu0 %296  ;;  %v1726_v11 = vpop.permute.xlu2 %111  ;;  %v1375_v5 = vor.u32 %v1508_v63, %v1372_v59 }
  0xba   :  { %v301_v12 = vrot.slane %v297_v10, 4  ;;  %v116_v30 = vrot.slane %v1726_v11, 4 }
  0xbc   :  { %v303_v13 = vsel %vm118_vm0, %v300_v8, %v301_v12  ;;  %v274_v14 = vpop.permute.xlu1 %273 }
  0xbd   :  { %v305_v15 = vsel %vm304_vm6, %v295_v45, %v303_v13  ;;  %v279_v16 = vrot.slane %v274_v14, 4 }
  0xbe   :  { %312 = vst [vmem:[#allocation3 + $0x8c] sm:$0x33] %v305_v15  ;;  %v361_v17 = vld [vmem:[#allocation3 + $0xa0] sm:$0xff] }
  0xbf   :  { %v282_v18 = vsel %vm118_vm0, %v279_v16, %v280_v47  ;;  %v431_v19 = vunpack.c.l.b16 %v361_v17  ;;  %v432_v20 = vunpack.c.h.b16 %v361_v17  ;;  %v363_v13 = vld [vmem:[#allocation3 + $0xb0] sm:$0xf] }
  0xc0   :  { %v284_v21 = vsel %vm283_vm3, %v274_v14, %v282_v18  ;;  %v362_v22 = vld [vmem:[#allocation3 + $0xa8] sm:$0xff] }
  0xc1   :  { %291 = vst [vmem:[#allocation3 + $0x78] sm:$0x33] %v284_v21  ;;  %v299_v23 = vpop.permute.xlu0 %298  ;;  %v456_v24 = vpack.c.b16 %v431_v19, %v431_v19  ;;  %v457_v25 = vpack.c.b16 %v432_v20, %v432_v20  ;;  %v433_v26 = vunpack.c.l.b16 %v362_v22  ;;  %v434_v27 = vunpack.c.h.b16 %v362_v22  ;;  %v114_v28 = vpop.permute.xlu2 %113  ;;  %v1350_v18 = vld [vmem:[#allocation3 + $0x28] sm:$0xf]  ;;  %v1503_v19 = vld [vmem:[#allocation3 + $0x2c] sm:$0xf] }
  0xc2   :  { %v302_v29 = vrot.slane %v299_v23, 4  ;;  %v117_v32 = vrot.slane %v114_v28, 4  ;;  %v1330_v20 = vld [vmem:[#allocation3] sm:$0xf]  ;;  %v435_v21 = vunpack.c.l.b16 %v363_v13 }
  0xc3   :  { %v487_v34 = vsel %vm118_vm0, %v456_v24, 0  ;;  %v490_v35 = vsel %vm118_vm0, %v457_v25, 0  ;;  %v458_v36 = vpack.c.b16 %v433_v26, %v433_v26  ;;  %v459_v37 = vpack.c.b16 %v434_v27, %v434_v27  ;;  %v1498_v27 = vld [vmem:[#allocation3 + $0x4] sm:$0xf] }
  0xc4   :  { %v306_v38 = vsel %vm118_vm0, %v301_v12, %v302_v29  ;;  %v308_v39 = vsel %vm304_vm6, %v299_v23, %v302_v29  ;;  %v1737_v40 = vpop.permute.xlu1 %183  ;;  %504 = vmatpush.bf16.msra.mxu0 %v487_v34  ;;  %517 = vmatpush.bf16.msra.mxu1 %v490_v35  ;;  %v122_v41 = vsel %vm118_vm0, %v116_v30, %v117_v32 }
  0xc5   :  { %v307_v42 = vsel %vm304_vm6, %v297_v10, %v306_v38  ;;  %314 = vst [vmem:[#allocation3 + $0x9c] sm:$0x3] %v308_v39  ;;  %v493_v43 = vsel %vm118_vm0, %v458_v36, 0  ;;  %v496_v44 = vsel %vm118_vm0, %v459_v37, 0  ;;  %v1515_v45 = vld [vmem:[#allocation3 + $0x88] sm:$0xf0]  ;;  %v123_v47 = vsel %vm120_vm7, %v1726_v11, %v122_v41 }
  0xc6   :  { %313 = vst [vmem:[#allocation3 + $0x94] sm:$0x33] %v307_v42  ;;  %530 = vmatpush.bf16.msra.mxu2 %v493_v43  ;;  %543 = vmatpush.bf16.msra.mxu3 %v496_v44  ;;  %v1392_v46 = vld [vmem:[#allocation3 + $0x8c] sm:$0xf0]  ;;  %v124_v48 = vsel %vm120_vm7, %v114_v28, %v117_v32  ;;  %v188_v50 = vrot.slane %v1737_v40, 4 }
  0xc7   :  { %129 = vst [vmem:[#allocation3 + $0x1c] sm:$0x33] %v123_v47  ;;  %v1378_v39 = vld [vmem:[#allocation3 + $0x58] sm:$0xf]  ;;  %v1509_v41 = vld [vmem:[#allocation3 + $0x5c] sm:$0xf] }
  0xc8   :  { %v1390_v51 = vld [vmem:[#allocation3 + $0x78] sm:$0xf]  ;;  %v1513_v53 = vld [vmem:[#allocation3 + $0x7c] sm:$0xf]  ;;  %130 = vst [vmem:[#allocation3 + $0x24] sm:$0x3] %v124_v48 }
  0xc9   :  { %v1391_v54 = vor.u32 %v1515_v45, %v1390_v51  ;;  %v1395_v55 = vor.u32 %v1513_v53, %v1392_v46  ;;  %v182_v56 = vpop.permute.xlu0 %181  ;;  %v1406_v42 = vld [vmem:[#allocation3 + $0x88] sm:$0xf]  ;;  %v336_v45 = vld [vmem:[%s2001_s2] sm:$0x3] }
  0xca   :  { %v187_v57 = vrot.slane %v182_v56, 4 }
  0xcb   :  { %505 = vmatpush.bf16.msra.mxu0 %v1391_v54  ;;  %518 = vmatpush.bf16.msra.mxu1 %v1395_v55  ;;  %v1386_v55 = vld [vmem:[#allocation3 + $0x60] sm:$0xf] }
  0xcc   :  { %v190_v61 = vsel %vm118_vm0, %v187_v57, %v188_v50  ;;  %v110_v62 = vpop.permute.xlu1 %109  ;;  %v1517_v46 = vld [vmem:[#allocation3 + $0x98] sm:$0xf0] }
  0xcd   :  { %v192_v2 = vsel %vm191_vm8, %v182_v56, %v190_v61  ;;  %v115_v3 = vrot.slane %v110_v62, 4  ;;  %v1516_v6 = vld [vmem:[#allocation3 + $0x90] sm:$0xf0]  ;;  %v1400_v7 = vld [vmem:[#allocation3 + $0x94] sm:$0xf0]  ;;  %v1407_v53 = vor.u32 %v1517_v46, %v1406_v42 }
  0xce   :  { %199 = vst [vmem:[#allocation3 + $0x3c] sm:$0x33] %v192_v2  ;;  %v1399_v8 = vor.u32 %v1516_v6, %v1398_v0  ;;  %v1403_v9 = vor.u32 %v1514_v1, %v1400_v7  ;;  %v1338_v0 = vld [vmem:[#allocation3 + $0x8] sm:$0xf]  ;;  %v1501_v2 = vld [vmem:[#allocation3 + $0x18] sm:$0xf0] }
  0xcf   :  { %v119_v10 = vsel %vm118_vm0, %v115_v3, %v116_v30  ;;  %506 = vmatpush.bf16.msra.mxu0 %v1371_v4  ;;  %519 = vmatpush.bf16.msra.mxu1 %v1375_v5  ;;  %v1499_v3 = vld [vmem:[#allocation3 + $0xc] sm:$0xf]  ;;  %v1340_v4 = vld [vmem:[#allocation3 + $0x1c] sm:$0xf0]  ;;  %v1346_v5 = vld [vmem:[#allocation3 + $0x10] sm:$0xf]  ;;  %v1339_v7 = vor.u32 %v1501_v2, %v1338_v0 }
  0xd0   :  { %v121_v11 = vsel %vm120_vm7, %v110_v62, %v119_v10  ;;  %531 = vmatpush.bf16.msra.mxu2 %v1399_v8  ;;  %544 = vmatpush.bf16.msra.mxu3 %v1403_v9  ;;  %v1502_v6 = vld [vmem:[#allocation3 + $0x20] sm:$0xf0]  ;;  %v1343_v8 = vor.u32 %v1499_v3, %v1340_v4  ;;  %v566_v2 = vld [vmem:[%s2002_s3] sm:$0xf]  ;;  %s1620_s3 = smov 19  }
  0xd1   :  { %128 = vst [vmem:[#allocation3 + $0x14] sm:$0x33] %v121_v11  ;;  %v228_v12 = vpop.permute.xlu0 %227  ;;  %v1347_v9 = vor.u32 %v1502_v6, %v1346_v5 }
  0xd2   :  { %v231_v14 = vrot.slane %v228_v12, 4 }
  0xd4   :  { %v235_v15 = vsel %vm118_vm0, %v230_v52, %v231_v14  ;;  %v237_v16 = vsel %vm233_vm4, %v228_v12, %v231_v14  ;;  %v186_v17 = vpop.permute.xlu1 %185  ;;  %v45_v12 = vld [vmem:[%s2000_s1] sm:$0x1f] }
  0xd5   :  { %v236_v22 = vsel %vm233_vm4, %v1708_v49, %v235_v15  ;;  %243 = vst [vmem:[#allocation3 + $0x74] sm:$0x3] %v237_v16  ;;  %v189_v23 = vrot.slane %v186_v17, 4  ;;  %v1505_v24 = vld [vmem:[#allocation3 + $0x38] sm:$0xf0]  ;;  %v460_v49 = vpack.c.b16 %v435_v21, %v435_v21  ;;  %v1783_v15 = vperm.slane %v45_v12, 0 }
  0xd6   :  { %242 = vst [vmem:[#allocation3 + $0x6c] sm:$0x33] %v236_v22  ;;  %v1351_v25 = vor.u32 %v1505_v24, %v1350_v18  ;;  %v1352_v26 = vld [vmem:[#allocation3 + $0x3c] sm:$0xf0]  ;;  %v1785_v16 = vperm.slane %v45_v12, 1  ;;  %v1797_v24 = vperm.slane %v45_v12, 3 }
  0xd7   :  { %v193_v28 = vsel %vm118_vm0, %v188_v50, %v189_v23  ;;  %v195_v52 = vsel %vm191_vm8, %v186_v17, %v189_v23  ;;  %v1355_v29 = vor.u32 %v1503_v19, %v1352_v26  ;;  %v499_v44 = vsel %vm118_vm0, %v460_v49, 0 }
  0xd8   :  { %v194_v30 = vsel %vm191_vm8, %v1737_v40, %v193_v28  ;;  %201 = vst [vmem:[#allocation3 + $0x4c] sm:$0x3] %v195_v52  ;;  %507 = vmatpush.bf16.msra.mxu0 %v1351_v25  ;;  %v1500_v32 = vld [vmem:[#allocation3 + $0x10] sm:$0xf0]  ;;  %v1332_v34 = vld [vmem:[#allocation3 + $0x14] sm:$0xf0] }
  0xd9   :  { %200 = vst [vmem:[#allocation3 + $0x44] sm:$0x33] %v194_v30  ;;  %520 = vmatpush.bf16.msra.mxu1 %v1355_v29  ;;  %v136_v35 = vpop.permute.xlu0 %135  ;;  %v1331_v36 = vor.u32 %v1500_v32, %v1330_v20  ;;  %v1335_v37 = vor.u32 %v1498_v27, %v1332_v34  ;;  %v1791_v19 = vperm.slane %v45_v12, 4  ;;  %v1795_v23 = vperm.slane %v45_v12, 2 }
  0xda   :  { %v139_v38 = vrot.slane %v136_v35, 4  ;;  %v1619_v12 = vmov 0.0  }
  0xdb   :  { %74 = vst.msk [vmem:[#allocation2] sm:$0xf] %vm73_vm13, %v1619_v12 }
  0xdc   :  { %v143_v43 = vsel %vm118_vm0, %v138_v33, %v139_v38  ;;  %v145_v40 = vsel %vm141_vm1, %v136_v35, %v139_v38  ;;  %508 = vmatpush.bf16.msra.mxu0 %v1331_v36  ;;  %v1512_v54 = vld [vmem:[#allocation3 + $0x70] sm:$0xf0]  ;;  %76 = vst.msk [vmem:[#allocation2 + $0x14] sm:$0xf] %vm75_vm14, %v1619_v12 }
  0xdd   :  { %v144_v47 = vsel %vm141_vm1, %v1699_v31, %v143_v43  ;;  %151 = vst [vmem:[#allocation3 + $0x38] sm:$0x3] %v145_v40  ;;  %521 = vmatpush.bf16.msra.mxu1 %v1335_v37  ;;  %v1511_v48 = vld [vmem:[#allocation3 + $0x68] sm:$0xf0]  ;;  %v1380_v50 = vld [vmem:[#allocation3 + $0x6c] sm:$0xf0]  ;;  %v1387_v56 = vor.u32 %v1512_v54, %v1386_v55 }
  0xde   :  { %150 = vst [vmem:[#allocation3 + $0x30] sm:$0x33] %v144_v47  ;;  %v1379_v33 = vor.u32 %v1511_v48, %v1378_v39  ;;  %v1383_v51 = vor.u32 %v1509_v41, %v1380_v50 }
  0xdf   :  { %1408 = vmatmul.msk.bf16.vlgmr.msra.gmra.mxu0 %vm481_vm9, %v336_v45  ;;  %v1507_v63 = vld [vmem:[#allocation3 + $0x48] sm:$0xf0] }
  0xe0   :  { %556 = vmatpush.bf16.msrb.mxu0 %v499_v44  ;;  %532 = vmatpush.bf16.msra.mxu2 %v1379_v33  ;;  %v1506_v31 = vld [vmem:[#allocation3 + $0x40] sm:$0xf0]  ;;  %v1360_v60 = vld [vmem:[#allocation3 + $0x44] sm:$0xf0] }
  0xe1   :  { %545 = vmatpush.bf16.msra.mxu3 %v1383_v51  ;;  %1409 = vmatmul.msk.bf16.vlgmr.msra.gmra.mxu1 %vm481_vm9, %v336_v45 }
  0xe4   :  { %557 = vmatpush.bf16.msrb.mxu0 %v1407_v53  ;;  %v1366_v57 = vld [vmem:[#allocation3 + $0x38] sm:$0xf] }
  0xe5   :  { %v1358_v58 = vld [vmem:[#allocation3 + $0x30] sm:$0xf]  ;;  %v1504_v59 = vld [vmem:[#allocation3 + $0x34] sm:$0xf]  ;;  %v1367_v1 = vor.u32 %v1507_v63, %v1366_v57 }
  0xe6   :  { %v1359_v61 = vor.u32 %v1506_v31, %v1358_v58  ;;  %v1363_v62 = vor.u32 %v1504_v59, %v1360_v60 }
  0xe8   :  { %558 = vmatpush.bf16.msrb.mxu0 %v1387_v56  ;;  %533 = vmatpush.bf16.msra.mxu2 %v1359_v61 }
  0xe9   :  { %546 = vmatpush.bf16.msra.mxu3 %v1363_v62 }
  0xec   :  { %559 = vmatpush.bf16.msrb.mxu0 %v1367_v1  ;;  %534 = vmatpush.bf16.msra.mxu2 %v1339_v7  ;;  %v567_v7 = vld [vmem:[%s2003_s4] sm:$0xf] }
  0xed   :  { %547 = vmatpush.bf16.msra.mxu3 %v1343_v8 }
  0xef   :  { %1410 = vmatmul.msk.bf16.vlgmr.msra.gmra.mxu2 %vm481_vm9, %v336_v45 }
  0xf0   :  { %560 = vmatpush.bf16.msrb.mxu0 %v1347_v9  ;;  %1411 = vmatmul.msk.bf16.vlgmr.msra.gmra.mxu3 %vm481_vm9, %v336_v45 }
  0xf3   :  { %1412 = vmatmul.msk.bf16.vlgmr.msrb.gmra.mxu0 %vm481_vm9, %v336_v45 }
 0x15c   :  { %v1776_v10 = vpop.f32.mrf.mxu0 }
 0x15d   :  { %v579_v17 = vmul.f32 %v1783_v15, %v1776_v10 }
 0x15e   :  { %v1778_v11 = vpop.f32.mrf.mxu1 }
 0x15f   :  { %v580_v18 = vmul.f32 %v1785_v16, %v1778_v11  ;;  %v595_v21 = vmul.f32 %v579_v17, %v579_v17  ;;  %v584_v26 = vsel %vm118_vm0, %v579_v17, 0.0 }
 0x161   :  { %v596_v22 = vmul.f32 %v580_v18, %v580_v18  ;;  %v585_v27 = vsel %vm118_vm0, %v580_v18, 0.0  ;;  %v600_v29 = vsel %vm118_vm0, %v595_v21, 0.0 }
 0x162   :  { %v586_v49 = vadd.f32 %v585_v27, %v584_v26 }
 0x163   :  { %v601_v30 = vsel %vm118_vm0, %v596_v22, 0.0 }
 0x164   :  { %v512_v13 = vpop.f32.mrf.mxu0  ;;  %v602_v42 = vadd.f32 %v601_v30, %v600_v29 }
 0x166   :  { %v525_v14 = vpop.f32.mrf.mxu1 }
 0x170   :  { %v1793_v20 = vpop.f32.mrf.mxu0 }
 0x171   :  { %v583_v25 = vmul.f32 %v1791_v19, %v1793_v20 }
 0x172   :  { %v1803_v28 = vpop.f32.mrf.mxu2 }
 0x173   :  { %v549_v52 = vpop.f32.mrf.mxu3  ;;  %v581_v32 = vmul.f32 %v1795_v23, %v1803_v28  ;;  %v599_v35 = vmul.f32 %v583_v25, %v583_v25  ;;  %v591_v44 = vsel %vm118_vm0, %v583_v25, 0.0 }
 0x174   :  { %v582_v34 = vmul.f32 %v1797_v24, %v549_v52 }
 0x175   :  { %v587_v36 = vsel %vm118_vm0, %v581_v32, 0.0  ;;  %v597_v37 = vmul.f32 %v581_v32, %v581_v32  ;;  %v607_v48 = vsel %vm118_vm0, %v599_v35, 0.0 }
 0x176   :  { %v589_v38 = vsel %vm118_vm0, %v582_v34, 0.0  ;;  %v598_v39 = vmul.f32 %v582_v34, %v582_v34  ;;  %v588_v43 = vadd.f32 %v587_v36, %v586_v49 }
 0x177   :  { %v603_v40 = vsel %vm118_vm0, %v597_v37, 0.0 }
 0x178   :  { %v564_v41 = vpop.f32.mrf.mxu0  ;;  %v605_v45 = vsel %vm118_vm0, %v598_v39, 0.0  ;;  %v590_v46 = vadd.f32 %v589_v38, %v588_v43  ;;  %v604_v47 = vadd.f32 %v603_v40, %v602_v42 }
 0x17a   :  { %v538_v50 = vpop.f32.mrf.mxu2  ;;  %v592_v51 = vadd.f32 %v591_v44, %v590_v46  ;;  %v606_v53 = vadd.f32 %v605_v45, %v604_v47 }
 0x17b   :  { %v551_v33 = vpop.f32.mrf.mxu3 }
 0x17c   :  { %593 = vadd.xlane.f32.xlu0 %v592_v51  ;;  %v608_v54 = vadd.f32 %v607_v48, %v606_v53 }
 0x17e   :  { %609 = vadd.xlane.f32.xlu1 %v608_v54 }
 0x1ef   :  { %v594_v55 = vpop.xlane.xlu0 %593 }
 0x1f0   :  { %v611_v56 = vmul.f32 0.001953125, %v594_v55 }
 0x1f1   :  { %v610_v31 = vpop.xlane.xlu1 %609 }
 0x1f2   :  { %v613_v57 = vmul.f32 %v611_v56, %v611_v56  ;;  %v612_v58 = vmul.f32 0.001953125, %v610_v31 }
 0x1f4   :  { %v614_v59 = vsub.f32 %v612_v58, %v613_v57 }
 0x1f6   :  { %v615_v60 = vadd.f32 1e-05, %v614_v59 }
 0x1f8   :  { %1553 = vrsqrt.f32 %v615_v60  ;;  %vm622_vm11 = vweird.f32 %v615_v60 }
 0x1fe   :  { %v1554_v61 = vpop.eup %1553 }
 0x1ff   :  { %v617_v62 = vmul.f32 %v1554_v61, %v615_v60  ;;  %vm623_vm10 = vweird.f32 %v1554_v61 }
 0x200   :  { %vm624_vm12 = vmor %vm622_vm11, %vm623_vm10  ;;  %vm677_vm10 = vcmask 154624  }
 0x201   :  { %v618_v63 = vmul.f32 %v1554_v61, %v617_v62  ;;  %vm687_vm11 = vmor %vm686_vm15, %vm75_vm14 }
 0x203   :  { %v619_v0 = vmul.f32 0.5, %v618_v63 }
 0x205   :  { %v620_v1 = vsub.f32 1.5, %v619_v0 }
 0x207   :  { %v621_v3 = vmul.f32 %v1554_v61, %v620_v1 }
 0x209   :  { %v625_v4 = vsel %vm624_vm12, %v1554_v61, %v621_v3  ;;  %vm690_vm12 = vcmask 154628  }
 0x20a   :  { %v626_v5 = vmul.f32 %v625_v4, %v566_v2  ;;  %vm691_vm13 = vmor %vm690_vm12, %vm118_vm0 }
 0x20c   :  { %631 = vperm.xlu2 %1551, %v626_v5   ;;  %v627_v6 = vmul.f32 %v626_v5, %v611_v56 }
 0x20e   :  { %v628_v8 = vsub.f32 %v567_v7, %v627_v6 }
 0x214   :  { %641 = vperm.xlu2 %1551, %v628_v8  }
 0x266   :  { %v632_v9 = vpop.permute.xlu2 %631 }
 0x267   :  { %v634_v13 = vmul.f32 %v632_v9, %v1776_v10  ;;  %v635_v14 = vmul.f32 %v632_v9, %v1778_v11  ;;  %v637_v17 = vmul.f32 %v632_v9, %v549_v52  ;;  %v636_v29 = vmul.f32 %v632_v9, %v1803_v28 }
 0x268   :  { %v638_v37 = vmul.f32 %v632_v9, %v1793_v20 }
 0x26e   :  { %v642_v18 = vpop.permute.xlu2 %641 }
 0x26f   :  { %v644_v21 = vadd.f32 %v642_v18, %v634_v13  ;;  %v645_v22 = vadd.f32 %v642_v18, %v635_v14  ;;  %v647_v25 = vadd.f32 %v642_v18, %v637_v17  ;;  %v646_v34 = vadd.f32 %v642_v18, %v636_v29 }
 0x270   :  { %v648_v28 = vadd.f32 %v642_v18, %v638_v37 }
 0x271   :  { %v649_v26 = vmax.f32 %v644_v21, 0.0  ;;  %v650_v27 = vmax.f32 %v645_v22, 0.0  ;;  %v652_v32 = vmax.f32 %v647_v25, 0.0  ;;  %v651_v52 = vmax.f32 %v646_v34, 0.0 }
 0x272   :  { %v653_v41 = vmax.f32 %v648_v28, 0.0 }
 0x273   :  { %v655_v30 = vmul.f32 %v650_v27, %v1785_v16  ;;  %v654_v49 = vmul.f32 %v649_v26, %v1783_v15  ;;  %v657_v11 = vmul.f32 %v652_v32, %v1797_v24  ;;  %v656_v38 = vmul.f32 %v651_v52, %v1795_v23 }
 0x274   :  { %v658_v42 = vmul.f32 %v653_v41, %v1791_v19 }
 0x275   :  { %v664_v35 = vrot.slane %v655_v30, 4  ;;  %v665_v36 = vrot.slane %v657_v11, 4 }
 0x277   :  { %v666_v10 = vsel %vm118_vm0, %v654_v49, %v664_v35  ;;  %v667_v39 = vsel %vm118_vm0, %v656_v38, %v665_v36 }
 0x278   :  { %668 = vrot.lane.b32.xlu2 %v666_v10, %s1620_s3 }
 0x280   :  { %670 = vrot.lane.b32.xlu2 %v667_v39, %s1620_s3 }
 0x288   :  { %672 = vrot.lane.b32.xlu2 %v658_v42, %s1620_s3 }
 0x2d2   :  { %v669_v43 = vpop.permute.xlu2 %668 }
 0x2d3   :  { %v674_v40 = vrot.slane %v669_v43, 4 }
 0x2d5   :  { %v678_v44 = vsel %vm677_vm10, %v674_v40, %v669_v43 }
 0x2d6   :  { %688 = vst.msk [vmem:[#allocation2] sm:$0xff] %vm687_vm11, %v678_v44 }
 0x2da   :  { %v671_v20 = vpop.permute.xlu2 %670 }
 0x2db   :  { %v675_v45 = vrot.slane %v671_v20, 4 }
 0x2dd   :  { %v693_v46 = vld [vmem:[#allocation2] sm:$0xff]  ;;  %v679_v47 = vsel %vm118_vm0, %v674_v40, %v675_v45 }
 0x2de   :  { %699 = vst [vmem:[#allocation1] ss:$2 sm:$0xff] %v693_v46  ;;  %v680_v48 = vsel %vm677_vm10, %v679_v47, %v671_v20 }
 0x2df   :  { %701 = vst [vmem:[#allocation1 + $0x10] ss:$2 sm:$0xff] %v680_v48 }
 0x2e2   :  { %v673_v50 = vpop.permute.xlu2 %672 }
 0x2e3   :  { %v676_v33 = vrot.slane %v673_v50, 4 }
 0x2e5   :  { %v681_v51 = vsel %vm118_vm0, %v675_v45, %v676_v33  ;;  %v704_v53 = vld.sshfl [vmem:[#allocation1] sm:$0xff pattern:$0x75316420]  ;;  %v705_v54 = vld.sshfl [vmem:[#allocation1 + $0x8] sm:$0xff pattern:$0x75316420] }
 0x2e6   :  { %v682_v55 = vsel %vm677_vm10, %v681_v51, %v673_v50  ;;  %v716_v56 = vpack.c.bf16 %v705_v54, %v704_v53  ;;  %771 = vst [vmem:[#allocation1] ss:$2 sm:$0xff] %v693_v46  ;;  %v706_v31 = vld.sshfl [vmem:[#allocation1 + $0x10] sm:$0xff pattern:$0x75316420] }
 0x2e7   :  { %692 = vst.msk [vmem:[#allocation2 + $0x10] sm:$0xff] %vm691_vm13, %v682_v55  ;;  %v707_v57 = vld.sshfl [vmem:[#allocation1 + $0x18] sm:$0xff pattern:$0x75316420] }
 0x2e8   :  { %745 = vrot.lane.b32.xlu1 %v716_v56, %s1611_s0  ;;  %719 = vst [vmem:[#allocation3] sm:$0x33] %v716_v56  ;;  %v717_v58 = vpack.c.bf16 %v707_v57, %v706_v31 }
 0x2e9   :  { %773 = vst [vmem:[#allocation1 + $0x10] ss:$2 sm:$0xff] %v680_v48 }
 0x2ea   :  { %747 = vrot.lane.b32.xlu0 %v717_v58, %s1611_s0  ;;  %720 = vst [vmem:[#allocation3 + $0x8] sm:$0x33] %v717_v58 }
 0x2ed   :  { %v776_v59 = vld.sshfl [vmem:[#allocation1] sm:$0xff pattern:$0x75316420]  ;;  %v777_v60 = vld.sshfl [vmem:[#allocation1 + $0x8] sm:$0xff pattern:$0x75316420] }
 0x2ee   :  { %v695_v61 = vld [vmem:[#allocation2 + $0x10] sm:$0xff]  ;;  %v788_v62 = vpack.c.bf16 %v777_v60, %v776_v59  ;;  %860 = vst [vmem:[#allocation1] ss:$2 sm:$0xff] %v693_v46 }
 0x2ef   :  { %703 = vst [vmem:[#allocation1 + $0x20] ss:$2 sm:$0xff] %v695_v61 }
 0x2f0   :  { %834 = vrot.lane.b32.xlu2 %v788_v62, %s1612_s10  ;;  %814 = vrot.lane.b32.xlu1 %v788_v62, %s1613_s11  ;;  %v778_v63 = vld.sshfl [vmem:[#allocation1 + $0x10] sm:$0xff pattern:$0x75316420]  ;;  %v779_v0 = vld.sshfl [vmem:[#allocation1 + $0x18] sm:$0xff pattern:$0x75316420] }
 0x2f1   :  { %v789_v1 = vpack.c.bf16 %v779_v0, %v778_v63  ;;  %862 = vst [vmem:[#allocation1 + $0x10] ss:$2 sm:$0xff] %v680_v48 }
 0x2f3   :  { %816 = vrot.lane.b32.xlu0 %v789_v1, %s1613_s11 }
 0x2f5   :  { %v865_v2 = vld.sshfl [vmem:[#allocation1] sm:$0xff pattern:$0x75316420]  ;;  %v866_v3 = vld.sshfl [vmem:[#allocation1 + $0x8] sm:$0xff pattern:$0x75316420] }
 0x2f6   :  { %v708_v4 = vld.sshfl [vmem:[#allocation1 + $0x20] sm:$0xff pattern:$0x75316420]  ;;  %v709_v5 = vld.sshfl [vmem:[#allocation1 + $0x28] sm:$0xff pattern:$0x75316420]  ;;  %v877_v6 = vpack.c.bf16 %v866_v3, %v865_v2 }
 0x2f7   :  { %775 = vst [vmem:[#allocation1 + $0x20] ss:$2 sm:$0xff] %v695_v61  ;;  %v718_v7 = vpack.c.bf16 %v709_v5, %v708_v4 }
 0x2f8   :  { %794 = vrot.lane.b32.xlu2 %v788_v62, %s1617_s15  ;;  %836 = vrot.lane.b32.xlu1 %v789_v1, %s1612_s10  ;;  %v867_v8 = vld.sshfl [vmem:[#allocation1 + $0x10] sm:$0xff pattern:$0x75316420]  ;;  %v868_v9 = vld.sshfl [vmem:[#allocation1 + $0x18] sm:$0xff pattern:$0x75316420] }
 0x2f9   :  { %721 = vst [vmem:[#allocation3 + $0x10] sm:$0x3] %v718_v7  ;;  %v878_v14 = vpack.c.bf16 %v868_v9, %v867_v8 }
 0x2fb   :  { %903 = vrot.lane.b32.xlu0 %v877_v6, %s1616_s14 }
 0x2fe   :  { %v780_v12 = vld.sshfl [vmem:[#allocation1 + $0x20] sm:$0xff pattern:$0x75316420]  ;;  %v781_v13 = vld.sshfl [vmem:[#allocation1 + $0x28] sm:$0xff pattern:$0x75316420] }
 0x2ff   :  { %864 = vst [vmem:[#allocation1 + $0x20] ss:$2 sm:$0xff] %v695_v61  ;;  %v790_v22 = vpack.c.bf16 %v781_v13, %v780_v12 }
 0x300   :  { %923 = vrot.lane.b32.xlu2 %v877_v6, %s1614_s12  ;;  %796 = vrot.lane.b32.xlu1 %v789_v1, %s1617_s15 }
 0x303   :  { %925 = vrot.lane.b32.xlu0 %v878_v14, %s1614_s12 }
 0x306   :  { %v869_v17 = vld.sshfl [vmem:[#allocation1 + $0x20] sm:$0xff pattern:$0x75316420]  ;;  %v870_v18 = vld.sshfl [vmem:[#allocation1 + $0x28] sm:$0xff pattern:$0x75316420] }
 0x307   :  { %v879_v21 = vpack.c.bf16 %v870_v18, %v869_v17 }
 0x308   :  { %883 = vrot.lane.b32.xlu2 %v877_v6, %s1615_s13 }
 0x309   :  { %927 = vrot.lane.b32.xlu1 %v879_v21, %s1614_s12 }
 0x30b   :  { %818 = vrot.lane.b32.xlu0 %v790_v22, %s1613_s11 }
 0x310   :  { %838 = vrot.lane.b32.xlu2 %v790_v22, %s1612_s10 }
 0x311   :  { %725 = vrot.lane.b32.xlu1 %v716_v56, %s1618_s16 }
 0x313   :  { %887 = vrot.lane.b32.xlu0 %v879_v21, %s1615_s13 }
 0x318   :  { %885 = vrot.lane.b32.xlu2 %v878_v14, %s1615_s13 }
 0x319   :  { %798 = vrot.lane.b32.xlu1 %v790_v22, %s1617_s15 }
 0x31b   :  { %727 = vrot.lane.b32.xlu0 %v717_v58, %s1618_s16 }
 0x320   :  { %905 = vrot.lane.b32.xlu2 %v878_v14, %s1616_s14 }
 0x323   :  { %729 = vrot.lane.b32.xlu0 %v718_v7, %s1618_s16 }
 0x328   :  { %907 = vrot.lane.b32.xlu2 %v879_v21, %s1616_s14 }
 0x330   :  { %749 = vrot.lane.b32.xlu2 %v718_v7, %s1611_s0 }
 0x34a   :  { %v835_v25 = vpop.permute.xlu2 %834 }
 0x34b   :  { %v840_v42 = vrot.slane %v835_v25, 4 }
 0x352   :  { %v795_v26 = vpop.permute.xlu2 %794 }
 0x353   :  { %v800_v51 = vrot.slane %v795_v26, 4 }
 0x35a   :  { %v746_v27 = vpop.permute.xlu1 %745  ;;  %v924_v29 = vpop.permute.xlu2 %923 }
 0x35b   :  { %v751_v30 = vrot.slane %v746_v27, 4  ;;  %v929_v58 = vrot.slane %v924_v29, 4 }
 0x35c   :  { %v1865_v32 = vpop.permute.xlu0 %747 }
 0x35d   :  { %v752_v34 = vrot.slane %v1865_v32, 4 }
 0x35f   :  { %v754_v49 = vsel %vm118_vm0, %v751_v30, %v752_v34 }
 0x360   :  { %v755_v35 = vsel %vm141_vm1, %v746_v27, %v754_v49 }
 0x361   :  { %762 = vst [vmem:[#allocation3 + $0x28] sm:$0x33] %v755_v35 }
 0x362   :  { %v815_v10 = vpop.permute.xlu1 %814  ;;  %v884_v11 = vpop.permute.xlu2 %883 }
 0x363   :  { %v820_v52 = vrot.slane %v815_v10, 4  ;;  %v889_v53 = vrot.slane %v884_v11, 4 }
 0x365   :  { %v817_v36 = vpop.permute.xlu0 %816 }
 0x366   :  { %v821_v37 = vrot.slane %v817_v36, 4 }
 0x368   :  { %v823_v38 = vsel %vm118_vm0, %v820_v52, %v821_v37 }
 0x369   :  { %v824_v28 = vsel %vm212_vm2, %v815_v10, %v823_v38 }
 0x36a   :  { %v839_v39 = vpop.permute.xlu2 %838  ;;  %v837_v41 = vpop.permute.xlu1 %836  ;;  %831 = vst [vmem:[#allocation3 + $0x50] sm:$0x33] %v824_v28 }
 0x36b   :  { %v842_v43 = vrot.slane %v839_v39, 4  ;;  %v841_v40 = vrot.slane %v837_v41, 4 }
 0x36d   :  { %v847_v44 = vsel %vm233_vm4, %v839_v39, %v842_v43  ;;  %v843_v20 = vsel %vm118_vm0, %v840_v42, %v841_v40  ;;  %v845_v45 = vsel %vm118_vm0, %v841_v40, %v842_v43  ;;  %v904_v46 = vpop.permute.xlu0 %903 }
 0x36e   :  { %853 = vst [vmem:[#allocation3 + $0x74] sm:$0x3] %v847_v44  ;;  %v844_v47 = vsel %vm233_vm4, %v835_v25, %v843_v20  ;;  %v846_v48 = vsel %vm233_vm4, %v837_v41, %v845_v45  ;;  %v909_v1 = vrot.slane %v904_v46, 4 }
 0x36f   :  { %851 = vst [vmem:[#allocation3 + $0x64] sm:$0x33] %v844_v47 }
 0x370   :  { %852 = vst [vmem:[#allocation3 + $0x6c] sm:$0x33] %v846_v48 }
 0x372   :  { %v1879_v50 = vpop.permute.xlu2 %885  ;;  %v1881_v33 = vpop.permute.xlu1 %796 }
 0x373   :  { %v890_v54 = vrot.slane %v1879_v50, 4  ;;  %v801_v55 = vrot.slane %v1881_v33, 4 }
 0x375   :  { %v892_v56 = vsel %vm118_vm0, %v889_v53, %v890_v54  ;;  %v803_v31 = vsel %vm118_vm0, %v800_v51, %v801_v55  ;;  %v926_v57 = vpop.permute.xlu0 %925 }
 0x376   :  { %v893_v59 = vsel %vm283_vm3, %v884_v11, %v892_v56  ;;  %v804_v60 = vsel %vm191_vm8, %v795_v26, %v803_v31  ;;  %v930_v61 = vrot.slane %v926_v57, 4  ;;  %v1530_v51 = vld [vmem:[#allocation3 + $0x60] sm:$0xf0] }
 0x377   :  { %900 = vst [vmem:[#allocation3 + $0x78] sm:$0x33] %v893_v59  ;;  %v1455_v59 = vld [vmem:[#allocation3 + $0x50] sm:$0xf] }
 0x378   :  { %811 = vst [vmem:[#allocation3 + $0x3c] sm:$0x33] %v804_v60  ;;  %v932_v62 = vsel %vm118_vm0, %v929_v58, %v930_v61 }
 0x379   :  { %v933_v63 = vsel %vm325_vm5, %v924_v29, %v932_v62 }
 0x37a   :  { %v906_v0 = vpop.permute.xlu2 %905  ;;  %940 = vst [vmem:[#allocation3 + $0xa0] sm:$0x33] %v933_v63  ;;  %v1528_v63 = vld [vmem:[#allocation3 + $0x54] sm:$0xf] }
 0x37b   :  { %v910_v2 = vrot.slane %v906_v0, 4  ;;  %v928_v3 = vpop.permute.xlu1 %927 }
 0x37c   :  { %v931_v4 = vrot.slane %v928_v3, 4 }
 0x37d   :  { %v912_v5 = vsel %vm118_vm0, %v909_v1, %v910_v2  ;;  %v819_v6 = vpop.permute.xlu0 %818 }
 0x37e   :  { %v913_v7 = vsel %vm304_vm6, %v904_v46, %v912_v5  ;;  %v934_v8 = vsel %vm118_vm0, %v930_v61, %v931_v4  ;;  %v936_v9 = vsel %vm325_vm5, %v928_v3, %v931_v4  ;;  %v822_v12 = vrot.slane %v819_v6, 4  ;;  %v1475_v44 = vld [vmem:[#allocation3 + $0x78] sm:$0xf]  ;;  %v1533_v20 = vld [vmem:[#allocation3 + $0x7c] sm:$0xf] }
 0x37f   :  { %920 = vst [vmem:[#allocation3 + $0x8c] sm:$0x33] %v913_v7  ;;  %v935_v13 = vsel %vm325_vm5, %v926_v57, %v934_v8  ;;  %v1457_v57 = vld [vmem:[#allocation3 + $0x64] sm:$0xf0]  ;;  %v1525_v5 = vld [vmem:[#allocation3 + $0x38] sm:$0xf0] }
 0x380   :  { %941 = vst [vmem:[#allocation3 + $0xa8] sm:$0x33] %v935_v13  ;;  %v825_v14 = vsel %vm118_vm0, %v821_v37, %v822_v12  ;;  %v827_v17 = vsel %vm212_vm2, %v819_v6, %v822_v12  ;;  %v1460_v4 = vor.u32 %v1528_v63, %v1457_v57  ;;  %v1437_v12 = vld [vmem:[#allocation3 + $0x3c] sm:$0xf0] }
 0x381   :  { %942 = vst [vmem:[#allocation3 + $0xb0] sm:$0x3] %v936_v9  ;;  %v826_v18 = vsel %vm212_vm2, %v817_v36, %v825_v14  ;;  %v968_v21 = vld [vmem:[#allocation3 + $0xa0] sm:$0xff] }
 0x382   :  { %v908_v22 = vpop.permute.xlu2 %907  ;;  %832 = vst [vmem:[#allocation3 + $0x58] sm:$0x33] %v826_v18  ;;  %v1038_v25 = vunpack.c.l.b16 %v968_v21  ;;  %v1039_v26 = vunpack.c.h.b16 %v968_v21  ;;  %v1523_v18 = vld [vmem:[#allocation3 + $0x2c] sm:$0xf]  ;;  %v943_v57 = vld [vmem:[%s2004_s5] sm:$0x3] }
 0x383   :  { %v911_v27 = vrot.slane %v908_v22, 4  ;;  %v1901_v29 = vpop.permute.xlu1 %725  ;;  %833 = vst [vmem:[#allocation3 + $0x60] sm:$0x3] %v827_v17  ;;  %v1435_v17 = vld [vmem:[#allocation3 + $0x28] sm:$0xf] }
 0x384   :  { %v1063_v30 = vpack.c.b16 %v1038_v25, %v1038_v25  ;;  %v1064_v49 = vpack.c.b16 %v1039_v26, %v1039_v26  ;;  %v1436_v21 = vor.u32 %v1525_v5, %v1435_v17 }
 0x385   :  { %v914_v35 = vsel %vm118_vm0, %v910_v2, %v911_v27  ;;  %v916_v10 = vsel %vm304_vm6, %v908_v22, %v911_v27  ;;  %v888_v11 = vpop.permute.xlu0 %887  ;;  %v1440_v22 = vor.u32 %v1523_v18, %v1437_v12 }
 0x386   :  { %v915_v52 = vsel %vm304_vm6, %v906_v0, %v914_v35  ;;  %922 = vst [vmem:[#allocation3 + $0x9c] sm:$0x3] %v916_v10  ;;  %v891_v36 = vrot.slane %v888_v11, 4  ;;  %v1092_v37 = vsel %vm118_vm0, %v1063_v30, 0  ;;  %v1095_v38 = vsel %vm118_vm0, %v1064_v49, 0 }
 0x387   :  { %921 = vst [vmem:[#allocation3 + $0x94] sm:$0x33] %v915_v52  ;;  %1109 = vmatpush.bf16.msrb.mxu1 %v1092_v37  ;;  %1122 = vmatpush.bf16.msrb.mxu2 %v1095_v38  ;;  %v969_v28 = vld [vmem:[#allocation3 + $0xa8] sm:$0xff]  ;;  %v1477_v45 = vld [vmem:[#allocation3 + $0x8c] sm:$0xf0]  ;;  %v731_v0 = vrot.slane %v1901_v29, 4 }
 0x388   :  { %v1535_v39 = vld [vmem:[#allocation3 + $0x88] sm:$0xf0]  ;;  %v894_v41 = vsel %vm118_vm0, %v890_v54, %v891_v36  ;;  %v896_v42 = vsel %vm283_vm3, %v888_v11, %v891_v36  ;;  %v1040_v43 = vunpack.c.l.b16 %v969_v28  ;;  %v1041_v40 = vunpack.c.h.b16 %v969_v28  ;;  %v970_v30 = vld [vmem:[#allocation3 + $0xb0] sm:$0xf] }
 0x389   :  { %v895_v46 = vsel %vm283_vm3, %v1879_v50, %v894_v41  ;;  %902 = vst [vmem:[#allocation3 + $0x88] sm:$0x3] %v896_v42  ;;  %v1476_v47 = vor.u32 %v1535_v39, %v1475_v44  ;;  %v1480_v48 = vor.u32 %v1533_v20, %v1477_v45  ;;  %v1456_v50 = vor.u32 %v1530_v51, %v1455_v59  ;;  %v1463_v49 = vld [vmem:[#allocation3 + $0x58] sm:$0xf]  ;;  %v1529_v35 = vld [vmem:[#allocation3 + $0x5c] sm:$0xf] }
 0x38a   :  { %v750_v53 = vpop.permute.xlu2 %749  ;;  %901 = vst [vmem:[#allocation3 + $0x80] sm:$0x33] %v895_v46  ;;  %v1065_v56 = vpack.c.b16 %v1040_v43, %v1040_v43  ;;  %v1066_v31 = vpack.c.b16 %v1041_v40, %v1041_v40  ;;  %v1531_v11 = vld [vmem:[#allocation3 + $0x68] sm:$0xf0]  ;;  %v1465_v52 = vld [vmem:[#allocation3 + $0x6c] sm:$0xf0]  ;;  %v1042_v36 = vunpack.c.l.b16 %v970_v30 }
 0x38b   :  { %v753_v54 = vrot.slane %v750_v53, 4  ;;  %v799_v58 = vpop.permute.xlu1 %798  ;;  %1110 = vmatpush.bf16.msrb.mxu1 %v1476_v47  ;;  %1123 = vmatpush.bf16.msrb.mxu2 %v1480_v48  ;;  %v1468_v38 = vor.u32 %v1529_v35, %v1465_v52  ;;  %v1415_v44 = vld [vmem:[#allocation3] sm:$0xf]  ;;  %v1518_v20 = vld [vmem:[#allocation3 + $0x4] sm:$0xf] }
 0x38c   :  { %v802_v60 = vrot.slane %v799_v58, 4  ;;  %v1098_v61 = vsel %vm118_vm0, %v1065_v56, 0  ;;  %v1101_v62 = vsel %vm118_vm0, %v1066_v31, 0 }
 0x38d   :  { %v756_v1 = vsel %vm118_vm0, %v752_v34, %v753_v54  ;;  %v758_v2 = vsel %vm141_vm1, %v750_v53, %v753_v54  ;;  %1135 = vmatpush.bf16.msrb.mxu3 %v1098_v61  ;;  %1148 = vmatpush.bf16.msra.mxu0 %v1101_v62  ;;  %v728_v3 = vpop.permute.xlu0 %727  ;;  %v1067_v53 = vpack.c.b16 %v1042_v36, %v1042_v36  ;;  %v1537_v59 = vld [vmem:[#allocation3 + $0x98] sm:$0xf0]  ;;  %v1423_v61 = vld [vmem:[#allocation3 + $0x8] sm:$0xf]  ;;  %v1519_v62 = vld [vmem:[#allocation3 + $0xc] sm:$0xf] }
 0x38e   :  { %v757_v6 = vsel %vm141_vm1, %v1865_v32, %v756_v1  ;;  %764 = vst [vmem:[#allocation3 + $0x38] sm:$0x3] %v758_v2  ;;  %v805_v7 = vsel %vm118_vm0, %v801_v55, %v802_v60  ;;  %v807_v8 = vsel %vm191_vm8, %v799_v58, %v802_v60  ;;  %v732_v9 = vrot.slane %v728_v3, 4  ;;  %v1536_v13 = vld [vmem:[#allocation3 + $0x90] sm:$0xf0] }
 0x38f   :  { %763 = vst [vmem:[#allocation3 + $0x30] sm:$0x33] %v757_v6  ;;  %v806_v34 = vsel %vm191_vm8, %v1881_v33, %v805_v7  ;;  %1111 = vmatpush.bf16.msrb.mxu1 %v1456_v50  ;;  %1124 = vmatpush.bf16.msrb.mxu2 %v1460_v4  ;;  %v1485_v14 = vld [vmem:[#allocation3 + $0x94] sm:$0xf0]  ;;  %v1104_v54 = vsel %vm118_vm0, %v1067_v53, 0 }
 0x390   :  { %812 = vst [vmem:[#allocation3 + $0x44] sm:$0x33] %v806_v34  ;;  %v734_v32 = vsel %vm118_vm0, %v731_v0, %v732_v9  ;;  %v1491_v58 = vld [vmem:[#allocation3 + $0x88] sm:$0xf]  ;;  %v1471_v0 = vld [vmem:[#allocation3 + $0x60] sm:$0xf] }
 0x391   :  { %813 = vst [vmem:[#allocation3 + $0x4c] sm:$0x3] %v807_v8  ;;  %v735_v55 = vsel %vm120_vm7, %v1901_v29, %v734_v32  ;;  %v1483_v25 = vld [vmem:[#allocation3 + $0x80] sm:$0xf]  ;;  %v1534_v26 = vld [vmem:[#allocation3 + $0x84] sm:$0xf]  ;;  %v1464_v29 = vor.u32 %v1531_v11, %v1463_v49  ;;  %v1492_v60 = vor.u32 %v1537_v59, %v1491_v58 }
 0x392   :  { %742 = vst [vmem:[#allocation3 + $0x14] sm:$0x33] %v735_v55  ;;  %v1484_v27 = vor.u32 %v1536_v13, %v1483_v25  ;;  %v1488_v33 = vor.u32 %v1534_v26, %v1485_v14  ;;  %v1248_v34 = vld [vmem:[#allocation4] sm:$0xff]  ;;  %v1249_v13 = vld [vmem:[#allocation4 + $0x8] sm:$0xff] }
 0x393   :  { %1112 = vmatpush.bf16.msrb.mxu1 %v1436_v21  ;;  %1125 = vmatpush.bf16.msrb.mxu2 %v1440_v22  ;;  %1254 = vst [vmem:[#allocation1] ss:$2 sm:$0xff] %v1248_v34 }
 0x394   :  { %1136 = vmatpush.bf16.msrb.mxu3 %v1484_v27  ;;  %1149 = vmatpush.bf16.msra.mxu0 %v1488_v33  ;;  %1256 = vst [vmem:[#allocation1 + $0x10] ss:$2 sm:$0xff] %v1249_v13 }
 0x395   :  { %v730_v10 = vpop.permute.xlu0 %729  ;;  %v1451_v5 = vld [vmem:[#allocation3 + $0x38] sm:$0xf] }
 0x396   :  { %v733_v37 = vrot.slane %v730_v10, 4  ;;  %v1443_v28 = vld [vmem:[#allocation3 + $0x30] sm:$0xf]  ;;  %v1524_v39 = vld [vmem:[#allocation3 + $0x34] sm:$0xf] }
 0x397   :  { %v1526_v41 = vld [vmem:[#allocation3 + $0x40] sm:$0xf0]  ;;  %v1445_v42 = vld [vmem:[#allocation3 + $0x44] sm:$0xf0] }
 0x398   :  { %v736_v43 = vsel %vm118_vm0, %v732_v9, %v733_v37  ;;  %v738_v40 = vsel %vm120_vm7, %v730_v10, %v733_v37  ;;  %1137 = vmatpush.bf16.msrb.mxu3 %v1464_v29  ;;  %1150 = vmatpush.bf16.msra.mxu0 %v1468_v38  ;;  %v1444_v48 = vor.u32 %v1526_v41, %v1443_v28  ;;  %v1527_v6 = vld [vmem:[#allocation3 + $0x48] sm:$0xf0]  ;;  %v1431_v9 = vld [vmem:[#allocation3 + $0x10] sm:$0xf] }
 0x399   :  { %v737_v45 = vsel %vm120_vm7, %v728_v3, %v736_v43  ;;  %744 = vst [vmem:[#allocation3 + $0x24] sm:$0x3] %v738_v40  ;;  %v1520_v46 = vld [vmem:[#allocation3 + $0x10] sm:$0xf0]  ;;  %v1417_v47 = vld [vmem:[#allocation3 + $0x14] sm:$0xf0]  ;;  %v1448_v51 = vor.u32 %v1524_v39, %v1445_v42  ;;  %v1452_v7 = vor.u32 %v1527_v6, %v1451_v5 }
 0x39a   :  { %743 = vst [vmem:[#allocation3 + $0x1c] sm:$0x33] %v737_v45  ;;  %v1416_v56 = vor.u32 %v1520_v46, %v1415_v44  ;;  %v1420_v31 = vor.u32 %v1518_v20, %v1417_v47  ;;  %v1532_v3 = vld [vmem:[#allocation3 + $0x70] sm:$0xf0]  ;;  %v1171_v5 = vld [vmem:[%s2005_s6] sm:$0xf] }
 0x39b   :  { %v1472_v4 = vor.u32 %v1532_v3, %v1471_v0  ;;  %v1260_v32 = vld.sshfl [vmem:[#allocation1 + $0x8] sm:$0xff pattern:$0x75316420]  ;;  %v1261_v22 = vld.sshfl [vmem:[#allocation1 + $0x10] sm:$0xff pattern:$0x75316420] }
 0x39c   :  { %1113 = vmatpush.bf16.msrb.mxu1 %v1416_v56  ;;  %1126 = vmatpush.bf16.msrb.mxu2 %v1420_v31  ;;  %v1259_v31 = vld.sshfl [vmem:[#allocation1] sm:$0xff pattern:$0x75316420]  ;;  %s1621_s6 = smov [#allocation7]  }
 0x39d   :  { %1138 = vmatpush.bf16.msrb.mxu3 %v1444_v48  ;;  %1151 = vmatpush.bf16.msra.mxu0 %v1448_v51 }
 0x39e   :  { %1267 = vrot.lane.b32.xlu0 %v1260_v32, %s1613_s11 }
 0x39f   :  { %1493 = vmatmul.msk.bf16.vlgmr.msrb.gmra.mxu1 %vm481_vm9, %v943_v57  ;;  %1494 = vmatmul.msk.bf16.vlgmr.msrb.gmra.mxu2 %vm481_vm9, %v943_v57 }
 0x3a0   :  { %1161 = vmatpush.bf16.msra.mxu1 %v1104_v54  ;;  %v1522_v8 = vld [vmem:[#allocation3 + $0x20] sm:$0xf0] }
 0x3a1   :  { %v1521_v50 = vld [vmem:[#allocation3 + $0x18] sm:$0xf0]  ;;  %v1425_v63 = vld [vmem:[#allocation3 + $0x1c] sm:$0xf0]  ;;  %v1432_v12 = vor.u32 %v1522_v8, %v1431_v9 }
 0x3a2   :  { %v1424_v1 = vor.u32 %v1521_v50, %v1423_v61  ;;  %v1428_v2 = vor.u32 %v1519_v62, %v1425_v63  ;;  %v1250_v61 = vld [vmem:[#allocation4 + $0x10] sm:$0xff] }
 0x3a3   :  { %1258 = vst [vmem:[#allocation1 + $0x20] ss:$2 sm:$0xff] %v1250_v61 }
 0x3a4   :  { %1162 = vmatpush.bf16.msra.mxu1 %v1492_v60  ;;  %1139 = vmatpush.bf16.msrb.mxu3 %v1424_v1 }
 0x3a5   :  { %1152 = vmatpush.bf16.msra.mxu0 %v1428_v2 }
 0x3a6   :  { %1269 = vrot.lane.b32.xlu0 %v1261_v22, %s1613_s11 }
 0x3a7   :  { %1495 = vmatmul.msk.bf16.vlgmr.msrb.gmra.mxu3 %vm481_vm9, %v943_v57 }
 0x3a8   :  { %1163 = vmatpush.bf16.msra.mxu1 %v1472_v4  ;;  %1496 = vmatmul.msk.bf16.vlgmr.msra.gmra.mxu0 %vm481_vm9, %v943_v57 }
 0x3aa   :  { %v1263_v63 = vld.sshfl [vmem:[#allocation1 + $0x20] sm:$0xff pattern:$0x75316420]  ;;  %v1264_v13 = vld.sshfl [vmem:[#allocation1 + $0x28] sm:$0xff pattern:$0x75316420] }
 0x3ac   :  { %1164 = vmatpush.bf16.msra.mxu1 %v1452_v7 }
 0x3ae   :  { %1265 = vrot.lane.b32.xlu0 %v1259_v31, %s1613_s11 }
 0x3b0   :  { %1165 = vmatpush.bf16.msra.mxu1 %v1432_v12  ;;  %v1172_v12 = vld [vmem:[%s2006_s7] sm:$0xf]  ;;  %s1316_s7 = sshll.u32 %s1621_s6, 4  ;;  %s1317_s7 = int_to_ptr.vmem [resolvable:$true] %s1316_s7 }
 0x3b3   :  { %1497 = vmatmul.msk.bf16.vlgmr.msra.gmra.mxu1 %vm481_vm9, %v943_v57 }
 0x410   :  { %v1268_v32 = vpop.permute.xlu0 %1267 }
 0x41c   :  { %v1942_v14 = vpop.f32.mrf.mxu1 }
 0x41d   :  { %v1173_v25 = vmul.f32 %v1942_v14, %v1783_v15 }
 0x41f   :  { %v1189_v33 = vmul.f32 %v1173_v25, %v1173_v25 }
 0x422   :  { %v1945_v17 = vpop.f32.mrf.mxu2 }
 0x423   :  { %v1174_v18 = vmul.f32 %v1945_v17, %v1785_v16  ;;  %v1178_v16 = vsel %vm118_vm0, %v1173_v25, 0.0 }
 0x424   :  { %v1117_v55 = vpop.f32.mrf.mxu1 }
 0x425   :  { %v1949_v21 = vpop.f32.mrf.mxu0  ;;  %v1190_v26 = vmul.f32 %v1174_v18, %v1174_v18  ;;  %v1179_v30 = vsel %vm118_vm0, %v1174_v18, 0.0  ;;  %v1270_v18 = vpop.permute.xlu0 %1269 }
 0x426   :  { %v1176_v27 = vmul.f32 %v1949_v21, %v1797_v24  ;;  %v1180_v52 = vadd.f32 %v1179_v30, %v1178_v16  ;;  %v1194_v24 = vsel %vm118_vm0, %v1189_v33, 0.0 }
 0x427   :  { %v1195_v10 = vsel %vm118_vm0, %v1190_v26, 0.0 }
 0x428   :  { %v1192_v11 = vmul.f32 %v1176_v27, %v1176_v27  ;;  %v1183_v37 = vsel %vm118_vm0, %v1176_v27, 0.0  ;;  %v1196_v28 = vadd.f32 %v1195_v10, %v1194_v24 }
 0x42a   :  { %v1130_v49 = vpop.f32.mrf.mxu2  ;;  %v1957_v35 = vpop.f32.mrf.mxu3 }
 0x42b   :  { %v1175_v15 = vmul.f32 %v1957_v35, %v1795_v23  ;;  %v1199_v23 = vsel %vm118_vm0, %v1192_v11, 0.0 }
 0x42d   :  { %v1156_v36 = vpop.f32.mrf.mxu0  ;;  %v1181_v29 = vsel %vm118_vm0, %v1175_v15, 0.0  ;;  %v1191_v38 = vmul.f32 %v1175_v15, %v1175_v15  ;;  %v1266_v55 = vpop.permute.xlu0 %1265 }
 0x42e   :  { %v1182_v39 = vadd.f32 %v1181_v29, %v1180_v52 }
 0x42f   :  { %v1197_v42 = vsel %vm118_vm0, %v1191_v38, 0.0 }
 0x430   :  { %v1966_v41 = vpop.f32.mrf.mxu1  ;;  %v1184_v40 = vadd.f32 %v1183_v37, %v1182_v39  ;;  %v1198_v44 = vadd.f32 %v1197_v42, %v1196_v28 }
 0x431   :  { %v1177_v43 = vmul.f32 %v1966_v41, %v1791_v19  ;;  %v1262_v19 = vld.sshfl [vmem:[#allocation1 + $0x18] sm:$0xff pattern:$0x75316420] }
 0x432   :  { %v1143_v46 = vpop.f32.mrf.mxu3  ;;  %v1200_v48 = vadd.f32 %v1199_v23, %v1198_v44 }
 0x433   :  { %v1193_v20 = vmul.f32 %v1177_v43, %v1177_v43  ;;  %v1185_v45 = vsel %vm118_vm0, %v1177_v43, 0.0 }
 0x434   :  { %v1186_v47 = vadd.f32 %v1185_v45, %v1184_v40 }
 0x435   :  { %v1201_v51 = vsel %vm118_vm0, %v1193_v20, 0.0 }
 0x436   :  { %1187 = vadd.xlane.f32.xlu2 %v1186_v47  ;;  %v1202_v53 = vadd.f32 %v1201_v51, %v1200_v48 }
 0x438   :  { %v1169_v56 = vpop.f32.mrf.mxu1  ;;  %1203 = vadd.xlane.f32.xlu1 %v1202_v53 }
 0x44e   :  { %1271 = vrot.lane.b32.xlu2 %v1262_v19, %s1613_s11 }
 0x451   :  { %1273 = vrot.lane.b32.xlu1 %v1263_v63, %s1613_s11 }
 0x4a9   :  { %v1188_v57 = vpop.xlane.xlu2 %1187 }
 0x4aa   :  { %v1205_v54 = vmul.f32 0.001953125, %v1188_v57 }
 0x4ab   :  { %v1204_v58 = vpop.xlane.xlu1 %1203 }
 0x4ac   :  { %v1207_v59 = vmul.f32 %v1205_v54, %v1205_v54  ;;  %v1206_v60 = vmul.f32 0.001953125, %v1204_v58 }
 0x4ae   :  { %v1208_v62 = vsub.f32 %v1206_v60, %v1207_v59 }
 0x4b0   :  { %v1209_v50 = vadd.f32 1e-05, %v1208_v62 }
 0x4b1   :  { %v1272_v16 = vpop.permute.xlu2 %1271 }
 0x4b2   :  { %1555 = vrsqrt.f32 %v1209_v50  ;;  %vm1216_vm3 = vweird.f32 %v1209_v50 }
 0x4b8   :  { %v1556_v0 = vpop.eup %1555 }
 0x4b9   :  { %v1211_v1 = vmul.f32 %v1556_v0, %v1209_v50  ;;  %vm1217_vm1 = vweird.f32 %v1556_v0 }
 0x4ba   :  { %vm1218_vm4 = vmor %vm1216_vm3, %vm1217_vm1 }
 0x4bb   :  { %v1212_v2 = vmul.f32 %v1556_v0, %v1211_v1 }
 0x4bd   :  { %v1213_v3 = vmul.f32 0.5, %v1212_v2 }
 0x4bf   :  { %v1214_v4 = vsub.f32 1.5, %v1213_v3 }
 0x4c1   :  { %v1215_v6 = vmul.f32 %v1556_v0, %v1214_v4 }
 0x4c3   :  { %v1219_v7 = vsel %vm1218_vm4, %v1556_v0, %v1215_v6  ;;  %v1274_v33 = vpop.permute.xlu1 %1273 }
 0x4c4   :  { %v1220_v8 = vmul.f32 %v1219_v7, %v1171_v5  ;;  %v1281_v36 = vsel %vm212_vm2, %v1272_v16, %v1274_v33 }
 0x4c6   :  { %1225 = vperm.xlu0 %1552, %v1220_v8   ;;  %v1221_v9 = vmul.f32 %v1220_v8, %v1205_v54 }
 0x4c8   :  { %v1222_v34 = vsub.f32 %v1172_v12, %v1221_v9 }
 0x4ce   :  { %1235 = vperm.xlu0 %1552, %v1222_v34  }
 0x4d6   :  { %1275 = vrot.lane.b32.xlu0 %v1264_v13, %s1613_s11 }
 0x538   :  { %v1226_v22 = vpop.permute.xlu0 %1225 }
 0x539   :  { %v1228_v25 = vmul.f32 %v1226_v22, %v1942_v14  ;;  %v1229_v26 = vmul.f32 %v1226_v22, %v1945_v17  ;;  %v1230_v27 = vmul.f32 %v1226_v22, %v1957_v35  ;;  %v1231_v30 = vmul.f32 %v1226_v22, %v1949_v21 }
 0x53a   :  { %v1232_v24 = vmul.f32 %v1226_v22, %v1966_v41  ;;  %v1279_v17 = vsel %vm212_vm2, %v1268_v32, %v1270_v18  ;;  %v1278_v35 = vsel %vm212_vm2, %v1266_v55, %v1268_v32  ;;  %v1280_v21 = vsel %vm212_vm2, %v1270_v18, %v1272_v16 }
 0x540   :  { %v1236_v49 = vpop.permute.xlu0 %1235 }
 0x541   :  { %v1238_v10 = vadd.f32 %v1236_v49, %v1228_v25  ;;  %v1239_v11 = vadd.f32 %v1236_v49, %v1229_v26  ;;  %v1240_v15 = vadd.f32 %v1236_v49, %v1230_v27  ;;  %v1241_v52 = vadd.f32 %v1236_v49, %v1231_v30 }
 0x542   :  { %v1242_v28 = vadd.f32 %v1236_v49, %v1232_v24 }
 0x543   :  { %v1243_v37 = vmax.f32 %v1238_v10, 0.0  ;;  %v1244_v29 = vmax.f32 %v1239_v11, 0.0  ;;  %v1245_v14 = vmax.f32 %v1240_v15, 0.0  ;;  %v1246_v38 = vmax.f32 %v1241_v52, 0.0 }
 0x544   :  { %v1247_v45 = vmax.f32 %v1242_v28, 0.0 }
 0x545   :  { %v1288_v39 = vadd.f32 %v1278_v35, %v1243_v37  ;;  %v1289_v42 = vadd.f32 %v1279_v17, %v1244_v29  ;;  %v1290_v43 = vadd.f32 %v1280_v21, %v1245_v14  ;;  %v1291_v23 = vadd.f32 %v1281_v36, %v1246_v38 }
 0x547   :  { %v1294_v40 = vmax.f32 %v1289_v42, 0.0  ;;  %v1296_v44 = vmax.f32 %v1291_v23, 0.0  ;;  %v1293_v20 = vmax.f32 %v1288_v39, 0.0  ;;  %v1295_v46 = vmax.f32 %v1290_v43, 0.0 }
 0x548   :  { %v1276_v41 = vpop.permute.xlu0 %1275 }
 0x549   :  { %v1302_v47 = vrot.slane %v1294_v40, 4  ;;  %v1303_v48 = vrot.slane %v1296_v44, 4  ;;  %v1282_v51 = vsel %vm212_vm2, %v1274_v33, %v1276_v41 }
 0x54a   :  { %v1292_v53 = vadd.f32 %v1282_v51, %v1247_v45 }
 0x54b   :  { %v1305_v56 = vsel %vm118_vm0, %v1295_v46, %v1303_v48  ;;  %v1304_v31 = vsel %vm118_vm0, %v1293_v20, %v1302_v47 }
 0x54c   :  { %1309 = vst [vmem:[#allocation7 + $0x8] sm:$0xff] %v1305_v56  ;;  %v1297_v19 = vmax.f32 %v1292_v53, 0.0 }
 0x54d   :  { %1308 = vst [vmem:[#allocation7] sm:$0xff] %v1304_v31 }
 0x54e   :  { %1310 = vst [vmem:[#allocation7 + $0x10] sm:$0xf] %v1297_v19 }
 0x54f   :  { %1321 = dma.vmem_to_hbm [thread:$0]  %s1317_s7, 320, %s1319_s29, [#allocation6]  }
 0x550   :  { %1607 = dma.done.wait [#allocation6], 320  }
 0x551   :  { %1608 = vsyncadd [#allocation6], 4294966976 }
 0x552   :  { %1326 = vsyncpa [#allocation5], 1 }
 0x553   :  { %1327 = vsyncpa [#allocation6], 1 }

</bundles_post_ra>
